<compile_context>
chip_gen: v6e
topology: v6e:2x2x1
jax: 0.10.0
libtpu: 0.0.40
codegen_flags: <defaults>
</compile_context>

<pallas_src>
import functools

import jax
import jax.numpy as jnp
from jax import lax
from jax.experimental import pallas as pl
from jax.experimental.pallas import tpu as pltpu

LANE = 128            # all output column dims padded to the TPU lane width
MAX_BATCH_TILE = 512  # rows per grid step; working set stays well under VMEM limits


def _round_up(n, m):
    return ((n + m - 1) // m) * m


def _pick_batch_tile(B):
    """Rows per grid step.

    Once B >= 32 the tile is capped at ~B/2 (rounded to a multiple of 16) so the
    grid always has >= 2 steps: the "parallel" batch axis then has something to
    shard across v7x's two TensorCores and there is a pipeline step to overlap
    the input-tile DMA.  Multiples of 8/16 preserve sublane packing.
    """
    if B < 32:
        return _round_up(B, 8)
    return min(MAX_BATCH_TILE, _round_up(pl.cdiv(B, 2), 16))


# ----------------------------------------------------------------------------
# Pallas kernel: fused 4-layer forward (conv1/conv2/conv3 as dense + ReLU, FC).
# Everything (weights + intermediates) stays resident in VMEM for the tile.
# ----------------------------------------------------------------------------
def _encoder_kernel(x_ref, w1_ref, b1_ref, w2_ref, b2_ref, w3_ref, b3_ref,
                    wf_ref, bf_ref, o_ref):
    compute_dtype = w1_ref.dtype   # bf16 operands -> MXU; f32 accumulation

    def layer(h, w_ref, b_ref, relu):
        acc = jnp.dot(h.astype(compute_dtype), w_ref[...],
                      preferred_element_type=jnp.float32)
        acc = acc + b_ref[...]                 # (1, N) broadcast, f32 epilogue
        if relu:
            # Downcast the hidden activation right after the ReLU: the next
            # matmul consumes bf16 anyway; halves spilled-intermediate VMEM.
            return jnp.maximum(acc, 0.0).astype(compute_dtype)
        return acc

    h = layer(x_ref[...], w1_ref, b1_ref, True)   # conv1 (+bias) + ReLU
    h = layer(h, w2_ref, b2_ref, True)            # conv2 + BN + ReLU
    h = layer(h, w3_ref, b3_ref, True)            # conv3 + BN + ReLU
    o_ref[...] = layer(h, wf_ref, bf_ref, False).astype(o_ref.dtype)   # fc


def encoder_pallas(prep, x_flat):
    """x_flat: (B, C*H*W) float (NCHW-flattened). Returns (B_padded, z_padded) bf16."""
    B, K1 = x_flat.shape
    K1p = prep["w1"].shape[0]
    Zp = prep["wf"].shape[1]

    tb = _pick_batch_tile(B)
    Bp = _round_up(B, tb)
    if (Bp, K1p) != (B, K1):
        # Pad batch to a multiple of the tile (no ragged OOB blocks) and the
        # contraction dim to the lane-aligned size used by the w1 rows.
        x_flat = jnp.pad(x_flat, ((0, Bp - B), (0, K1p - K1)))
    grid = (Bp // tb,)

    def const2(i):
        return (0, 0)

    def resident(shape):
        # Constant index_map: fetched once, stays VMEM-resident across steps.
        return pl.BlockSpec(shape, const2)

    return pl.pallas_call(
        _encoder_kernel,
        out_shape=jax.ShapeDtypeStruct((Bp, Zp), jnp.bfloat16),
        grid=grid,
        in_specs=[
            pl.BlockSpec((tb, K1p), lambda i: (i, 0)),
            resident(prep["w1"].shape), resident(prep["b1"].shape),
            resident(prep["w2"].shape), resident(prep["b2"].shape),
            resident(prep["w3"].shape), resident(prep["b3"].shape),
            resident(prep["wf"].shape), resident(prep["bf"].shape),
        ],
        out_specs=pl.BlockSpec((tb, Zp), lambda i: (i, 0)),
        compiler_params=pltpu.CompilerParams(
            dimension_semantics=("parallel",),   # batch tiles are independent
            vmem_limit_bytes=32 * 1024 * 1024),  # explicit; safe on v5e/v6e/v7x
    )(x_flat, prep["w1"], prep["b1"], prep["w2"], prep["b2"],
      prep["w3"], prep["b3"], prep["wf"], prep["bf"])


# ----------------------------------------------------------------------------
# Prepare-time lowering: eval-mode Conv2d(+folded BN) -> dense matrix on the
# NCHW-flattened activation. Row order (cin,h,w), column order (cout,oh,ow),
# both matching PyTorch's .view(N, -1) flattening, so layers chain directly
# and the FC weight needs no permutation.
# ----------------------------------------------------------------------------
def conv_to_dense(w, scale, bias, H, W, stride, pad):
    Cout, Cin, K, _ = w.shape
    OH = (H + 2 * pad - K) // stride + 1
    OW = (W + 2 * pad - K) // stride + 1
    h_idx = jnp.arange(OH)[:, None] * stride + jnp.arange(K)[None, :] - pad  # (OH,K)
    w_idx = jnp.arange(OW)[:, None] * stride + jnp.arange(K)[None, :] - pad  # (OW,K)
    # One-hot selectors; out-of-range (padding) indices simply match nothing.
    oh_h = (h_idx[:, :, None] == jnp.arange(H)[None, None, :]).astype(w.dtype)  # (OH,K,H)
    oh_w = (w_idx[:, :, None] == jnp.arange(W)[None, None, :]).astype(w.dtype)  # (OW,K,W)
    # M[cin,h,w, cout,oh,ow] = sum_{kh,kw} w[cout,cin,kh,kw]*[h==oh*s+kh-pad]*[w==ow*s+kw-pad]
    M = jnp.einsum("ocij,pih,qjw->chwopq", w, oh_h, oh_w)
    M = M.reshape(Cin * H * W, Cout * OH * OW)
    M = M * jnp.repeat(scale, OH * OW)[None, :]    # fold BN scale into weights
    b_cols = jnp.repeat(bias, OH * OW)             # conv bias + BN shift per column
    return M, b_cols, OH, OW


def prepare_params(p, H, W, stride, pad, compute_dtype=jnp.bfloat16):
    """Fold BN, build dense per-layer operators, pad row/col dims to 128 lanes."""
    def pad_cols(m, n_to):
        return jnp.pad(m, [(0, 0)] * (m.ndim - 1) + [(0, n_to - m.shape[-1])])

    def pad_rows(m, n_to):
        return jnp.pad(m, ((0, n_to - m.shape[0]), (0, 0)))

    m1, b1, H2, W2 = conv_to_dense(p["w1"], p["s1"], p["b1"], H, W, stride, pad)
    m2, b2, H3, W3 = conv_to_dense(p["w2"], p["s2"], p["b2"], H2, W2, stride, pad)
    m3, b3, H4, W4 = conv_to_dense(p["w3"], p["s3"], p["b3"], H3, W3, stride, pad)
    wf = p["w_fc"].T          # pre-transpose ONCE: (fc_in, z_dim)
    bf = p["b_fc"]

    # Guard against silent mis-chaining of the dense lowering.
    assert m2.shape[0] == m1.shape[1], (m2.shape, m1.shape)
    assert m3.shape[0] == m2.shape[1], (m3.shape, m2.shape)
    assert wf.shape[0] == m3.shape[1] == p["w3"].shape[0] * H4 * W4, (
        wf.shape, m3.shape, (p["w3"].shape[0], H4, W4))

    k1p = _round_up(m1.shape[0], LANE)   # lane-aligned K for the layer-1 lhs
    n1, n2, n3, z = m1.shape[1], m2.shape[1], m3.shape[1], wf.shape[1]
    n1p, n2p, n3p, zp = (_round_up(v, LANE) for v in (n1, n2, n3, z))

    m1 = pad_cols(pad_rows(m1, k1p), n1p)
    b1 = pad_cols(b1[None, :], n1p)
    m2 = pad_cols(pad_rows(m2, n1p), n2p)
    b2 = pad_cols(b2[None, :], n2p)
    m3 = pad_cols(pad_rows(m3, n2p), n3p)
    b3 = pad_cols(b3[None, :], n3p)
    wf = pad_cols(pad_rows(wf, n3p), zp)
    bf = pad_cols(bf[None, :], zp)

    return {
        "w1": m1.astype(compute_dtype), "b1": b1.astype(jnp.float32),
        "w2": m2.astype(compute_dtype), "b2": b2.astype(jnp.float32),
        "w3": m3.astype(compute_dtype), "b3": b3.astype(jnp.float32),
        "wf": wf.astype(compute_dtype), "bf": bf.astype(jnp.float32),
    }


# ----------------------------------------------------------------------------
# Parameter init mimicking the PyTorch module (BN folded in eval mode).
# ----------------------------------------------------------------------------
def init_params(key, in_channels, dim, z_dim, ksize, h, w, stride, pad):
    ks = jax.random.split(key, 16)
    std = 0.05
    eps = 1e-5

    def conv_w(k, cout, cin):
        return jax.random.normal(k, (cout, cin, ksize, ksize), jnp.float32) * std

    p = {}
    # conv1: no BN -> scale = 1, bias = conv bias
    p["w1"] = conv_w(ks[0], dim, in_channels)
    p["s1"] = jnp.ones((dim,), jnp.float32)
    p["b1"] = jax.random.normal(ks[1], (dim,), jnp.float32) * std

    # conv2 + BN(dim*2), eval-mode folding
    d2 = dim * 2
    p["w2"] = conv_w(ks[2], d2, dim)
    b2 = jax.random.normal(ks[3], (d2,), jnp.float32) * std
    g2 = 1.0 + 0.1 * jax.random.normal(ks[4], (d2,), jnp.float32)
    beta2 = 0.1 * jax.random.normal(ks[5], (d2,), jnp.float32)
    rm2 = 0.1 * jax.random.normal(ks[6], (d2,), jnp.float32)
    rv2 = jnp.abs(1.0 + 0.1 * jax.random.normal(ks[7], (d2,), jnp.float32))
    sc2 = g2 / jnp.sqrt(rv2 + eps)
    p["s2"] = sc2
    p["b2"] = (b2 - rm2) * sc2 + beta2

    # conv3 + BN(dim*4)
    d4 = dim * 4
    p["w3"] = conv_w(ks[8], d4, d2)
    b3 = jax.random.normal(ks[9], (d4,), jnp.float32) * std
    g3 = 1.0 + 0.1 * jax.random.normal(ks[10], (d4,), jnp.float32)
    beta3 = 0.1 * jax.random.normal(ks[11], (d4,), jnp.float32)
    rm3 = 0.1 * jax.random.normal(ks[12], (d4,), jnp.float32)
    rv3 = jnp.abs(1.0 + 0.1 * jax.random.normal(ks[13], (d4,), jnp.float32))
    sc3 = g3 / jnp.sqrt(rv3 + eps)
    p["s3"] = sc3
    p["b3"] = (b3 - rm3) * sc3 + beta3

    # fc: input dim inferred exactly like the torch dummy pass
    oh, ow = h, w
    for _ in range(3):
        oh = (oh + 2 * pad - ksize) // stride + 1
        ow = (ow + 2 * pad - ksize) // stride + 1
    fc_in = d4 * oh * ow
    p["w_fc"] = jax.random.normal(ks[14], (z_dim, fc_in), jnp.float32) * std
    p["b_fc"] = jax.random.normal(ks[15], (z_dim,), jnp.float32) * std
    return p


# ----------------------------------------------------------------------------
# Forward: one fused Pallas call; only a (metadata-only) flatten, optional
# zero-pad and a final slice happen outside it.  Input stays f32 into the
# kernel (the bf16 cast for the MXU happens in-kernel — no extra HBM pass).
# ----------------------------------------------------------------------------
@functools.partial(jax.jit, static_argnames=("z_dim",))
def encoder_mnist_forward(prep, img, *, z_dim):
    n = img.shape[0]
    x_flat = img.reshape(n, -1)                 # NCHW flatten == (c,h,w) rows
    out = encoder_pallas(prep, x_flat)          # (n padded, z padded to 128) bf16
    return out[:n, :z_dim]


# ----------------------------------------------------------------------------
# Pure-JAX f32 reference (eval-mode BN folded into scale/shift), for testing.
# ----------------------------------------------------------------------------
def reference_forward(p, img, stride, pad):
    def block(x, w, scale, shift):
        y = lax.conv_general_dilated(
            x, w, window_strides=(stride, stride),
            padding=[(pad, pad), (pad, pad)],
            dimension_numbers=("NCHW", "OIHW", "NCHW"))
        y = y * scale[None, :, None, None] + shift[None, :, None, None]
        return jnp.maximum(y, 0.0)

    h = block(img, p["w1"], p["s1"], p["b1"])
    h = block(h, p["w2"], p["s2"], p["b2"])
    h = block(h, p["w3"], p["s3"], p["b3"])
    h = h.reshape(h.shape[0], -1)
    return h @ p["w_fc"].T + p["b_fc"]


if __name__ == "__main__":
    # Small shapes: in_channels=1, spatial=16, dim=16, z_dim=32.
    C, H, W = 1, 16, 16
    DIM, Z_DIM, KSIZE, STRIDE, PAD = 16, 32, 5, 2, 2

    key = jax.random.PRNGKey(0)
    k_param, k_x = jax.random.split(key)
    params = init_params(k_param, C, DIM, Z_DIM, KSIZE, H, W, STRIDE, PAD)
    prep = prepare_params(params, H, W, STRIDE, PAD)

    # Run 1: tiny batch (B=2) — single grid step.
    x = jax.random.normal(k_x, (2, C, H, W), jnp.float32)
    z = jax.block_until_ready(encoder_mnist_forward(prep, x, z_dim=Z_DIM))
    assert z.shape == (2, Z_DIM), z.shape
    z_ref = reference_forward(params, x, STRIDE, PAD)
    err = float(jnp.max(jnp.abs(z.astype(jnp.float32) - z_ref)))
    assert err < 5e-2, f"max |err| = {err}"

    # Run 2: B=48 — exercises the >=2-step grid (megacore-shardable batch axis)
    # and the ragged-batch zero-padding path.
    x2 = jax.random.normal(jax.random.split(k_x)[0], (48, C, H, W), jnp.float32)
    z2 = jax.block_until_ready(encoder_mnist_forward(prep, x2, z_dim=Z_DIM))
    assert z2.shape == (48, Z_DIM), z2.shape
    z2_ref = reference_forward(params, x2, STRIDE, PAD)
    err2 = float(jnp.max(jnp.abs(z2.astype(jnp.float32) - z2_ref)))
    assert err2 < 5e-2, f"max |err| = {err2}"

    print("KERNEL_OK")
</pallas_src>

<mosaic_0001>
module attributes {stable_mosaic.version = 11 : i64} {
  func.func @_encoder_kernel(%arg0: i32, %arg1: memref<8x256xf32, #tpu.memory_space<vmem>>, %arg2: memref<256x1024xbf16, #tpu.memory_space<vmem>>, %arg3: memref<1x1024xf32, #tpu.memory_space<vmem>>, %arg4: memref<1024x512xbf16, #tpu.memory_space<vmem>>, %arg5: memref<1x512xf32, #tpu.memory_space<vmem>>, %arg6: memref<512x256xbf16, #tpu.memory_space<vmem>>, %arg7: memref<1x256xf32, #tpu.memory_space<vmem>>, %arg8: memref<256x128xbf16, #tpu.memory_space<vmem>>, %arg9: memref<1x128xf32, #tpu.memory_space<vmem>>, %arg10: memref<8x128xbf16, #tpu.memory_space<vmem>>) attributes {dimension_semantics = [#tpu.dimension_semantics<parallel>], iteration_bounds = array<i64: 1>, scalar_prefetch = 0 : i64, scratch_operands = 0 : i64, tpu.core_type = #tpu.core_type<tc>, window_params = [{transform_indices = @transform_0, window_bounds = array<i64: 8, 256>}, {pipeline_mode = #tpu.pipeline_mode<synchronous>, transform_indices = @transform_1, window_bounds = array<i64: 256, 1024>}, {pipeline_mode = #tpu.pipeline_mode<synchronous>, transform_indices = @transform_2, window_bounds = array<i64: 1, 1024>}, {pipeline_mode = #tpu.pipeline_mode<synchronous>, transform_indices = @transform_3, window_bounds = array<i64: 1024, 512>}, {pipeline_mode = #tpu.pipeline_mode<synchronous>, transform_indices = @transform_4, window_bounds = array<i64: 1, 512>}, {pipeline_mode = #tpu.pipeline_mode<synchronous>, transform_indices = @transform_5, window_bounds = array<i64: 512, 256>}, {pipeline_mode = #tpu.pipeline_mode<synchronous>, transform_indices = @transform_6, window_bounds = array<i64: 1, 256>}, {pipeline_mode = #tpu.pipeline_mode<synchronous>, transform_indices = @transform_7, window_bounds = array<i64: 256, 128>}, {pipeline_mode = #tpu.pipeline_mode<synchronous>, transform_indices = @transform_8, window_bounds = array<i64: 1, 128>}, {transform_indices = @transform_9, window_bounds = array<i64: 8, 128>}]} {
    %c0 = arith.constant 0 : index
    %c0_0 = arith.constant 0 : index
    %0 = vector.load %arg1[%c0, %c0_0] : memref<8x256xf32, #tpu.memory_space<vmem>>, vector<8x256xf32>
    %1 = arith.truncf %0 : vector<8x256xf32> to vector<8x256xbf16>
    %c0_1 = arith.constant 0 : index
    %c0_2 = arith.constant 0 : index
    %2 = vector.load %arg2[%c0_1, %c0_2] : memref<256x1024xbf16, #tpu.memory_space<vmem>>, vector<256x1024xbf16>
    %cst = arith.constant dense<0.000000e+00> : vector<8x1024xf32>
    %3 = tpu.matmul %1, %2, %cst {dimension_numbers = #tpu.dot_dimension_numbers<[1], [0], [0], [1], [0, 0, 1, 1], [], []>} : vector<8x256xbf16>, vector<256x1024xbf16>, vector<8x1024xf32> -> vector<8x1024xf32>
    %c0_3 = arith.constant 0 : index
    %c0_4 = arith.constant 0 : index
    %4 = vector.load %arg3[%c0_3, %c0_4] : memref<1x1024xf32, #tpu.memory_space<vmem>>, vector<1x1024xf32>
    %5 = vector.broadcast %4 : vector<1x1024xf32> to vector<8x1024xf32>
    %6 = arith.addf %3, %5 : vector<8x1024xf32>
    %cst_5 = arith.constant 0.000000e+00 : f32
    %7 = vector.broadcast %cst_5 : f32 to vector<8x1024xf32>
    %8 = arith.maximumf %6, %7 : vector<8x1024xf32>
    %9 = arith.truncf %8 : vector<8x1024xf32> to vector<8x1024xbf16>
    %c0_6 = arith.constant 0 : index
    %c0_7 = arith.constant 0 : index
    %10 = vector.load %arg4[%c0_6, %c0_7] : memref<1024x512xbf16, #tpu.memory_space<vmem>>, vector<1024x512xbf16>
    %cst_8 = arith.constant dense<0.000000e+00> : vector<8x512xf32>
    %11 = tpu.matmul %9, %10, %cst_8 {dimension_numbers = #tpu.dot_dimension_numbers<[1], [0], [0], [1], [0, 0, 1, 1], [], []>} : vector<8x1024xbf16>, vector<1024x512xbf16>, vector<8x512xf32> -> vector<8x512xf32>
    %c0_9 = arith.constant 0 : index
    %c0_10 = arith.constant 0 : index
    %12 = vector.load %arg5[%c0_9, %c0_10] : memref<1x512xf32, #tpu.memory_space<vmem>>, vector<1x512xf32>
    %13 = vector.broadcast %12 : vector<1x512xf32> to vector<8x512xf32>
    %14 = arith.addf %11, %13 : vector<8x512xf32>
    %cst_11 = arith.constant 0.000000e+00 : f32
    %15 = vector.broadcast %cst_11 : f32 to vector<8x512xf32>
    %16 = arith.maximumf %14, %15 : vector<8x512xf32>
    %17 = arith.truncf %16 : vector<8x512xf32> to vector<8x512xbf16>
    %c0_12 = arith.constant 0 : index
    %c0_13 = arith.constant 0 : index
    %18 = vector.load %arg6[%c0_12, %c0_13] : memref<512x256xbf16, #tpu.memory_space<vmem>>, vector<512x256xbf16>
    %cst_14 = arith.constant dense<0.000000e+00> : vector<8x256xf32>
    %19 = tpu.matmul %17, %18, %cst_14 {dimension_numbers = #tpu.dot_dimension_numbers<[1], [0], [0], [1], [0, 0, 1, 1], [], []>} : vector<8x512xbf16>, vector<512x256xbf16>, vector<8x256xf32> -> vector<8x256xf32>
    %c0_15 = arith.constant 0 : index
    %c0_16 = arith.constant 0 : index
    %20 = vector.load %arg7[%c0_15, %c0_16] : memref<1x256xf32, #tpu.memory_space<vmem>>, vector<1x256xf32>
    %21 = vector.broadcast %20 : vector<1x256xf32> to vector<8x256xf32>
    %22 = arith.addf %19, %21 : vector<8x256xf32>
    %cst_17 = arith.constant 0.000000e+00 : f32
    %23 = vector.broadcast %cst_17 : f32 to vector<8x256xf32>
    %24 = arith.maximumf %22, %23 : vector<8x256xf32>
    %25 = arith.truncf %24 : vector<8x256xf32> to vector<8x256xbf16>
    %c0_18 = arith.constant 0 : index
    %c0_19 = arith.constant 0 : index
    %26 = vector.load %arg8[%c0_18, %c0_19] : memref<256x128xbf16, #tpu.memory_space<vmem>>, vector<256x128xbf16>
    %cst_20 = arith.constant dense<0.000000e+00> : vector<8x128xf32>
    %27 = tpu.matmul %25, %26, %cst_20 {dimension_numbers = #tpu.dot_dimension_numbers<[1], [0], [0], [1], [0, 0, 1, 1], [], []>} : vector<8x256xbf16>, vector<256x128xbf16>, vector<8x128xf32> -> vector<8x128xf32>
    %c0_21 = arith.constant 0 : index
    %c0_22 = arith.constant 0 : index
    %28 = vector.load %arg9[%c0_21, %c0_22] : memref<1x128xf32, #tpu.memory_space<vmem>>, vector<1x128xf32>
    %29 = vector.broadcast %28 : vector<1x128xf32> to vector<8x128xf32>
    %30 = arith.addf %27, %29 : vector<8x128xf32>
    %31 = arith.truncf %30 : vector<8x128xf32> to vector<8x128xbf16>
    %c0_23 = arith.constant 0 : index
    %c0_24 = arith.constant 0 : index
    %32 = vector.load %arg10[%c0_23, %c0_24] : memref<8x128xbf16, #tpu.memory_space<vmem>>, vector<8x128xbf16>
    tpu.vector_store %arg10[%c0_23, %c0_24], %31 {strides = array<i32>} : memref<8x128xbf16, #tpu.memory_space<vmem>>, vector<8x128xbf16>,
    return
  }
  func.func @transform_0(%arg0: i32) -> (i32, i32) {
    %c0_i32 = arith.constant 0 : i32
    %c0_i32_0 = arith.constant 0 : i32
    return %arg0, %c0_i32 : i32, i32
  }
  func.func @transform_1(%arg0: i32) -> (i32, i32) {
    %c0_i32 = arith.constant 0 : i32
    %c0_i32_0 = arith.constant 0 : i32
    %c0_i32_1 = arith.constant 0 : i32
    return %c0_i32, %c0_i32_0 : i32, i32
  }
  func.func @transform_2(%arg0: i32) -> (i32, i32) {
    %c0_i32 = arith.constant 0 : i32
    %c0_i32_0 = arith.constant 0 : i32
    %c0_i32_1 = arith.constant 0 : i32
    return %c0_i32, %c0_i32_0 : i32, i32
  }
  func.func @transform_3(%arg0: i32) -> (i32, i32) {
    %c0_i32 = arith.constant 0 : i32
    %c0_i32_0 = arith.constant 0 : i32
    %c0_i32_1 = arith.constant 0 : i32
    return %c0_i32, %c0_i32_0 : i32, i32
  }
  func.func @transform_4(%arg0: i32) -> (i32, i32) {
    %c0_i32 = arith.constant 0 : i32
    %c0_i32_0 = arith.constant 0 : i32
    %c0_i32_1 = arith.constant 0 : i32
    return %c0_i32, %c0_i32_0 : i32, i32
  }
  func.func @transform_5(%arg0: i32) -> (i32, i32) {
    %c0_i32 = arith.constant 0 : i32
    %c0_i32_0 = arith.constant 0 : i32
    %c0_i32_1 = arith.constant 0 : i32
    return %c0_i32, %c0_i32_0 : i32, i32
  }
  func.func @transform_6(%arg0: i32) -> (i32, i32) {
    %c0_i32 = arith.constant 0 : i32
    %c0_i32_0 = arith.constant 0 : i32
    %c0_i32_1 = arith.constant 0 : i32
    return %c0_i32, %c0_i32_0 : i32, i32
  }
  func.func @transform_7(%arg0: i32) -> (i32, i32) {
    %c0_i32 = arith.constant 0 : i32
    %c0_i32_0 = arith.constant 0 : i32
    %c0_i32_1 = arith.constant 0 : i32
    return %c0_i32, %c0_i32_0 : i32, i32
  }
  func.func @transform_8(%arg0: i32) -> (i32, i32) {
    %c0_i32 = arith.constant 0 : i32
    %c0_i32_0 = arith.constant 0 : i32
    %c0_i32_1 = arith.constant 0 : i32
    return %c0_i32, %c0_i32_0 : i32, i32
  }
  func.func @transform_9(%arg0: i32) -> (i32, i32) {
    %c0_i32 = arith.constant 0 : i32
    %c0_i32_0 = arith.constant 0 : i32
    return %arg0, %c0_i32 : i32, i32
  }
}

</mosaic_0001>

<bundles_post_ra>
// kernel: encoder_mnist_forward.1
= control target key start
LH: loop header
LB: loop body
LE: loop exit
PB: predicated region body
PF: predicated region fallthrough
CT: control target
= control target key end

     0   :  { %14 = vsyncpa [#allocation3], 0  ;;  %s4918_s0 = inlined_call_operand.vmem [shape: f32[8,256], index: 0, kind: input, shape index: {}]   ;;  %s4919_s1 = inlined_call_operand.hbm [shape: bf16[256,1024], index: 1, kind: input, shape index: {}]   ;;  %s4920_s2 = inlined_call_operand.vmem [shape: f32[1,1024], index: 2, kind: input, shape index: {}]   ;;  %s4921_s3 = inlined_call_operand.hbm [shape: bf16[1024,512], index: 3, kind: input, shape index: {}]   ;;  %s4922_s4 = inlined_call_operand.vmem [shape: f32[1,512], index: 4, kind: input, shape index: {}]   ;;  %s4923_s5 = inlined_call_operand.hbm [shape: bf16[512,256], index: 5, kind: input, shape index: {}]   ;;  %s4924_s6 = inlined_call_operand.vmem [shape: f32[1,256], index: 6, kind: input, shape index: {}]   ;;  %s4925_s7 = inlined_call_operand.hbm [shape: bf16[256,128], index: 7, kind: input, shape index: {}]   ;;  %s4926_s8 = inlined_call_operand.vmem [shape: f32[1,128], index: 8, kind: input, shape index: {}]   ;;  %s4927_s9 = inlined_call_operand.vmem [shape: bf16[8,128], index: 9, kind: output, shape index: {}]  }
   0x1   :  { %15 = vsyncpa [#allocation5], 0 }
   0x2   :  { %16 = vsyncpa [#allocation8], 0  ;;  %s4723_s30 = smov [#allocation4]  }
   0x3   :  { %s38_s10 = sshll.u32 %s4723_s30, 4  ;;  %s39_s10 = int_to_ptr.vmem [resolvable:$true] %s38_s10 }
   0x4   :  { %s4645_s11 = scalar_lea.vmem %s39_s10, 32768  ;;  %p4650_p1 = scmp.lt.s32.totalorder %s39_s10, %s39_s10 }
   0x5   :  { %p4646_p0 = scmp.ne.s32.totalorder %s39_s10, %s4645_s11  ;;  %p4651_p2 = scmp.lt.s32.totalorder %s4645_s11, %s4645_s11 }
   0x7   :  { %p4652_p3 = por %p4651_p2, %p4650_p1 }
   0x9   :  { %p4653_p4 = pnand %p4652_p3, %p4646_p0 }
   0xb   :  { %4656 = shalt.err (!%p4653_p4)
}
   0xc   :  { %s4724_s12 = smov 256   ;;  %s4725_s13 = smov 16  }
   0xd   :  { %44 = dma.hbm_to_vmem [thread:$0]  %s4921_s3, 32768, %s39_s10, [#allocation5], %s4724_s12, %s4724_s12, %s4725_s13  }
   0xe   :  { %s4726_s16 = smov [#allocation2]  }
   0xf   :  { %s24_s17 = sshll.u32 %s4726_s16, 4  ;;  %s25_s17 = int_to_ptr.vmem [resolvable:$true] %s24_s17 }
  0x10   :  { %s4665_s18 = scalar_lea.vmem %s25_s17, 16384  ;;  %p4670_p6 = scmp.lt.s32.totalorder %s25_s17, %s25_s17 }
  0x11   :  { %p4666_p5 = scmp.ne.s32.totalorder %s25_s17, %s4665_s18  ;;  %p4671_p7 = scmp.lt.s32.totalorder %s4665_s18, %s4665_s18 }
  0x13   :  { %p4672_p8 = por %p4671_p7, %p4670_p6 }
  0x15   :  { %p4673_p9 = pnand %p4672_p8, %p4666_p5 }
  0x17   :  { %4676 = shalt.err (!%p4673_p9)
}
  0x18   :  { %s4727_s19 = smov 512   ;;  %s4728_s20 = smov 32  }
  0x19   :  { %30 = dma.hbm_to_vmem [thread:$0]  %s4919_s1, 16384, %s25_s17, [#allocation3], %s4727_s19, %s4727_s19, %s4728_s20  }
  0x1a   :  { %s4729_s23 = smov [#allocation6]  }
  0x1b   :  { %s52_s24 = sshll.u32 %s4729_s23, 4  ;;  %s53_s24 = int_to_ptr.vmem [resolvable:$true] %s52_s24 }
  0x1c   :  { %s4685_s3 = scalar_lea.vmem %s53_s24, 8192  ;;  %p4690_p11 = scmp.lt.s32.totalorder %s53_s24, %s53_s24 }
  0x1d   :  { %p4686_p10 = scmp.ne.s32.totalorder %s53_s24, %s4685_s3  ;;  %p4691_p12 = scmp.lt.s32.totalorder %s4685_s3, %s4685_s3 }
  0x1f   :  { %p4692_p13 = por %p4691_p12, %p4690_p11 }
  0x21   :  { %p4693_p0 = pnand %p4692_p13, %p4686_p10 }
  0x23   :  { %4696 = shalt.err (!%p4693_p0)
}
  0x24   :  { %s4730_s25 = smov 128   ;;  %s4731_s26 = smov 8  }
  0x25   :  { %58 = dma.hbm_to_vmem [thread:$0]  %s4923_s5, 8192, %s53_s24, [#allocation5], %s4730_s25, %s4730_s25, %s4731_s26  }
  0x26   :  { %s4732_s29 = smov [#allocation7]  }
  0x27   :  { %s66_s30 = sshll.u32 %s4732_s29, 4  ;;  %s67_s30 = int_to_ptr.vmem [resolvable:$true] %s66_s30 }
  0x28   :  { %s4705_s1 = scalar_lea.vmem %s67_s30, 2048  ;;  %p4710_p2 = scmp.lt.s32.totalorder %s67_s30, %s67_s30 }
  0x29   :  { %p4706_p1 = scmp.ne.s32.totalorder %s67_s30, %s4705_s1  ;;  %p4711_p3 = scmp.lt.s32.totalorder %s4705_s1, %s4705_s1 }
  0x2b   :  { %p4712_p4 = por %p4711_p3, %p4710_p2 }
  0x2d   :  { %p4713_p5 = pnand %p4712_p4, %p4706_p1 }
  0x2f   :  { %4716 = shalt.err (!%p4713_p5)
}
  0x30   :  { %s4733_s10 = smov 64   ;;  %s4734_s11 = smov 4  }
  0x31   :  { %72 = dma.hbm_to_vmem [thread:$0]  %s4925_s7, 2048, %s67_s30, [#allocation8], %s4733_s10, %s4733_s10, %s4734_s11  }
  0x32   :  { %4717 = dma.done.wait [#allocation3], 16384  }
  0x33   :  { %4718 = vsyncadd [#allocation3], 4294950912 }
  0x34   :  { %4719 = dma.done.wait [#allocation5], 40960  }
  0x35   :  { %4720 = vsyncadd [#allocation5], 4294926336 }
  0x36   :  { %4721 = dma.done.wait [#allocation8], 2048  }
  0x37   :  { %4722 = vsyncadd [#allocation8], 4294965248  ;;  %v148_v0 = vld [vmem:[#allocation2 + $0x1c0] sm:$0xff]  ;;  %v149_v2 = vld [vmem:[#allocation2 + $0x1c8] sm:$0xff] }
  0x38   :  { %v152_v1 = vld [vmem:[#allocation2 + $0x1e0] sm:$0xff]  ;;  %v153_v4 = vld [vmem:[#allocation2 + $0x1e8] sm:$0xff] }
  0x39   :  { %v3699_v3 = vcombine.high %v148_v0, %v152_v1  ;;  %v3698_v5 = vcombine.low %v148_v0, %v152_v1  ;;  %v140_v6 = vld [vmem:[#allocation2 + $0x180] sm:$0xff]  ;;  %v3701_v8 = vcombine.high %v149_v2, %v153_v4  ;;  %v3700_v9 = vcombine.low %v149_v2, %v153_v4  ;;  %v141_v11 = vld [vmem:[#allocation2 + $0x188] sm:$0xff] }
  0x3a   :  { %v144_v7 = vld [vmem:[#allocation2 + $0x1a0] sm:$0xff]  ;;  %v145_v12 = vld [vmem:[#allocation2 + $0x1a8] sm:$0xff] }
  0x3b   :  { %v3691_v10 = vcombine.high %v140_v6, %v144_v7  ;;  %v132_v13 = vld [vmem:[#allocation2 + $0x140] sm:$0xff]  ;;  %902 = vmatprep.subr.bf16.mxu0 %v3699_v3  ;;  %v3693_v14 = vcombine.high %v141_v11, %v145_v12  ;;  %v133_v16 = vld [vmem:[#allocation2 + $0x148] sm:$0xff]  ;;  %943 = vmatprep.subr.bf16.mxu1 %v3701_v8  ;;  %v3690_v18 = vcombine.low %v140_v6, %v144_v7 }
  0x3c   :  { %v136_v15 = vld [vmem:[#allocation2 + $0x160] sm:$0xff]  ;;  %v137_v17 = vld [vmem:[#allocation2 + $0x168] sm:$0xff]  ;;  %903 = vmatpush1.bf16.msra.mxu0 %v3698_v5  ;;  %944 = vmatpush1.bf16.msra.mxu1 %v3700_v9  ;;  %v3692_v19 = vcombine.low %v141_v11, %v145_v12 }
  0x3d   :  { %904 = vmatprep.subr.bf16.mxu0 %v3691_v10  ;;  %v3683_v20 = vcombine.high %v132_v13, %v136_v15  ;;  %945 = vmatprep.subr.bf16.mxu1 %v3693_v14  ;;  %v3685_v21 = vcombine.high %v133_v16, %v137_v17  ;;  %v124_v22 = vld [vmem:[#allocation2 + $0x100] sm:$0xff]  ;;  %v125_v24 = vld [vmem:[#allocation2 + $0x108] sm:$0xff]  ;;  %v3682_v26 = vcombine.low %v132_v13, %v136_v15 }
  0x3e   :  { %v128_v23 = vld [vmem:[#allocation2 + $0x120] sm:$0xff]  ;;  %v129_v25 = vld [vmem:[#allocation2 + $0x128] sm:$0xff]  ;;  %v3684_v27 = vcombine.low %v133_v16, %v137_v17 }
  0x3f   :  { %v3675_v28 = vcombine.high %v124_v22, %v128_v23  ;;  %v3677_v29 = vcombine.high %v125_v24, %v129_v25  ;;  %v116_v30 = vld [vmem:[#allocation2 + $0xc0] sm:$0xff]  ;;  %v117_v32 = vld [vmem:[#allocation2 + $0xc8] sm:$0xff]  ;;  %v3674_v34 = vcombine.low %v124_v22, %v128_v23  ;;  %v3676_v35 = vcombine.low %v125_v24, %v129_v25 }
  0x40   :  { %905 = vmatpush1.bf16.msra.mxu0 %v3690_v18  ;;  %946 = vmatpush1.bf16.msra.mxu1 %v3692_v19  ;;  %v120_v31 = vld [vmem:[#allocation2 + $0xe0] sm:$0xff]  ;;  %v121_v33 = vld [vmem:[#allocation2 + $0xe8] sm:$0xff] }
  0x41   :  { %906 = vmatprep.subr.bf16.mxu0 %v3683_v20  ;;  %947 = vmatprep.subr.bf16.mxu1 %v3685_v21  ;;  %v3667_v36 = vcombine.high %v116_v30, %v120_v31  ;;  %v3669_v37 = vcombine.high %v117_v32, %v121_v33  ;;  %v108_v38 = vld [vmem:[#allocation2 + $0x80] sm:$0xff]  ;;  %v109_v40 = vld [vmem:[#allocation2 + $0x88] sm:$0xff]  ;;  %v3666_v42 = vcombine.low %v116_v30, %v120_v31 }
  0x42   :  { %v112_v39 = vld [vmem:[#allocation2 + $0xa0] sm:$0xff]  ;;  %v113_v41 = vld [vmem:[#allocation2 + $0xa8] sm:$0xff]  ;;  %v3668_v43 = vcombine.low %v117_v32, %v121_v33 }
  0x43   :  { %v3659_v44 = vcombine.high %v108_v38, %v112_v39  ;;  %v3661_v45 = vcombine.high %v109_v40, %v113_v41  ;;  %v100_v46 = vld [vmem:[#allocation2 + $0x40] sm:$0xff]  ;;  %v101_v48 = vld [vmem:[#allocation2 + $0x48] sm:$0xff]  ;;  %v3658_v50 = vcombine.low %v108_v38, %v112_v39  ;;  %v3660_v51 = vcombine.low %v109_v40, %v113_v41 }
  0x44   :  { %907 = vmatpush1.bf16.msra.mxu0 %v3682_v26  ;;  %948 = vmatpush1.bf16.msra.mxu1 %v3684_v27  ;;  %v104_v47 = vld [vmem:[#allocation2 + $0x60] sm:$0xff]  ;;  %v105_v49 = vld [vmem:[#allocation2 + $0x68] sm:$0xff] }
  0x45   :  { %908 = vmatprep.subr.bf16.mxu0 %v3675_v28  ;;  %949 = vmatprep.subr.bf16.mxu1 %v3677_v29  ;;  %v3651_v52 = vcombine.high %v100_v46, %v104_v47  ;;  %v89_v53 = vld [vmem:[%s4918_s0 + $0x8] sm:$0xff]  ;;  %v3653_v54 = vcombine.high %v101_v48, %v105_v49  ;;  %v92_v55 = vld [vmem:[#allocation2] sm:$0xff]  ;;  %v3650_v60 = vcombine.low %v100_v46, %v104_v47 }
  0x46   :  { %v96_v56 = vld [vmem:[#allocation2 + $0x20] sm:$0xff]  ;;  %v4800_v57 = vpack.c.bf16 %v89_v53, %v89_v53  ;;  %v93_v58 = vld [vmem:[#allocation2 + $0x8] sm:$0xff]  ;;  %v3652_v61 = vcombine.low %v101_v48, %v105_v49 }
  0x47   :  { %v97_v59 = vld [vmem:[#allocation2 + $0x28] sm:$0xff]  ;;  %v3643_v62 = vcombine.high %v92_v55, %v96_v56  ;;  %v212_v0 = vld [vmem:[#allocation2 + $0x3c0] sm:$0xff]  ;;  %v3642_v4 = vcombine.low %v92_v55, %v96_v56 }
  0x48   :  { %909 = vmatpush1.bf16.msra.mxu0 %v3674_v34  ;;  %950 = vmatpush1.bf16.msra.mxu1 %v3676_v35  ;;  %v3645_v63 = vcombine.high %v93_v58, %v97_v59  ;;  %v216_v1 = vld [vmem:[#allocation2 + $0x3e0] sm:$0xff]  ;;  %v213_v2 = vld [vmem:[#allocation2 + $0x3c8] sm:$0xff]  ;;  %v3644_v5 = vcombine.low %v93_v58, %v97_v59 }
  0x49   :  { %910 = vmatprep.subr.bf16.mxu0 %v3667_v36  ;;  %951 = vmatprep.subr.bf16.mxu1 %v3669_v37  ;;  %v217_v3 = vld [vmem:[#allocation2 + $0x3e8] sm:$0xff]  ;;  %v3763_v6 = vcombine.high %v212_v0, %v216_v1  ;;  %v204_v8 = vld [vmem:[#allocation2 + $0x380] sm:$0xff]  ;;  %v3762_v12 = vcombine.low %v212_v0, %v216_v1  ;;  %v150_v0 = vld [vmem:[#allocation2 + $0x1d0] sm:$0xff] }
  0x4a   :  { %934 = vmatprep.mubr.bf16.mxu0 %v4800_v57  ;;  %975 = vmatprep.mubr.bf16.mxu1 %v4800_v57  ;;  %v3765_v7 = vcombine.high %v213_v2, %v217_v3  ;;  %v208_v9 = vld [vmem:[#allocation2 + $0x3a0] sm:$0xff]  ;;  %v205_v10 = vld [vmem:[#allocation2 + $0x388] sm:$0xff]  ;;  %v3764_v13 = vcombine.low %v213_v2, %v217_v3  ;;  %v154_v1 = vld [vmem:[#allocation2 + $0x1f0] sm:$0xff] }
  0x4b   :  { %v209_v11 = vld [vmem:[#allocation2 + $0x3a8] sm:$0xff]  ;;  %v3755_v14 = vcombine.high %v204_v8, %v208_v9  ;;  %v196_v16 = vld [vmem:[#allocation2 + $0x340] sm:$0xff]  ;;  %v3754_v20 = vcombine.low %v204_v8, %v208_v9  ;;  %v151_v3 = vld [vmem:[#allocation2 + $0x1d8] sm:$0xff]  ;;  %v3703_v8 = vcombine.high %v150_v0, %v154_v1 }
  0x4c   :  { %911 = vmatpush1.bf16.msra.mxu0 %v3666_v42  ;;  %952 = vmatpush1.bf16.msra.mxu1 %v3668_v43  ;;  %v3757_v15 = vcombine.high %v205_v10, %v209_v11  ;;  %v200_v17 = vld [vmem:[#allocation2 + $0x360] sm:$0xff]  ;;  %v197_v18 = vld [vmem:[#allocation2 + $0x348] sm:$0xff]  ;;  %v3756_v21 = vcombine.low %v205_v10, %v209_v11  ;;  %v142_v9 = vld [vmem:[#allocation2 + $0x190] sm:$0xff] }
  0x4d   :  { %912 = vmatprep.subr.bf16.mxu0 %v3659_v44  ;;  %953 = vmatprep.subr.bf16.mxu1 %v3661_v45  ;;  %v201_v19 = vld [vmem:[#allocation2 + $0x368] sm:$0xff]  ;;  %v3747_v22 = vcombine.high %v196_v16, %v200_v17  ;;  %v188_v24 = vld [vmem:[#allocation2 + $0x300] sm:$0xff]  ;;  %v3746_v28 = vcombine.low %v196_v16, %v200_v17  ;;  %v146_v10 = vld [vmem:[#allocation2 + $0x1b0] sm:$0xff] }
  0x4e   :  { %v3749_v23 = vcombine.high %v197_v18, %v201_v19  ;;  %v192_v25 = vld [vmem:[#allocation2 + $0x320] sm:$0xff]  ;;  %v189_v26 = vld [vmem:[#allocation2 + $0x308] sm:$0xff]  ;;  %v3748_v29 = vcombine.low %v197_v18, %v201_v19  ;;  %v3695_v17 = vcombine.high %v142_v9, %v146_v10  ;;  %v134_v18 = vld [vmem:[#allocation2 + $0x150] sm:$0xff] }
  0x4f   :  { %v193_v27 = vld [vmem:[#allocation2 + $0x328] sm:$0xff]  ;;  %v3739_v30 = vcombine.high %v188_v24, %v192_v25  ;;  %v180_v32 = vld [vmem:[#allocation2 + $0x2c0] sm:$0xff]  ;;  %v3738_v36 = vcombine.low %v188_v24, %v192_v25  ;;  %v138_v19 = vld [vmem:[#allocation2 + $0x170] sm:$0xff] }
  0x50   :  { %913 = vmatpush1.bf16.msra.mxu0 %v3658_v50  ;;  %954 = vmatpush1.bf16.msra.mxu1 %v3660_v51  ;;  %v3741_v31 = vcombine.high %v189_v26, %v193_v27  ;;  %v184_v33 = vld [vmem:[#allocation2 + $0x2e0] sm:$0xff]  ;;  %v181_v34 = vld [vmem:[#allocation2 + $0x2c8] sm:$0xff]  ;;  %v3740_v37 = vcombine.low %v189_v26, %v193_v27  ;;  %v3687_v25 = vcombine.high %v134_v18, %v138_v19  ;;  %v126_v26 = vld [vmem:[#allocation2 + $0x110] sm:$0xff] }
  0x51   :  { %914 = vmatprep.subr.bf16.mxu0 %v3651_v52  ;;  %955 = vmatprep.subr.bf16.mxu1 %v3653_v54  ;;  %v185_v35 = vld [vmem:[#allocation2 + $0x2e8] sm:$0xff]  ;;  %v3731_v38 = vcombine.high %v180_v32, %v184_v33  ;;  %v172_v39 = vld [vmem:[#allocation2 + $0x280] sm:$0xff]  ;;  %v3730_v44 = vcombine.low %v180_v32, %v184_v33  ;;  %v130_v27 = vld [vmem:[#allocation2 + $0x130] sm:$0xff] }
  0x52   :  { %v176_v40 = vld [vmem:[#allocation2 + $0x2a0] sm:$0xff]  ;;  %v3733_v41 = vcombine.high %v181_v34, %v185_v35  ;;  %v173_v42 = vld [vmem:[#allocation2 + $0x288] sm:$0xff]  ;;  %v3732_v45 = vcombine.low %v181_v34, %v185_v35  ;;  %v3679_v33 = vcombine.high %v126_v26, %v130_v27  ;;  %v118_v34 = vld [vmem:[#allocation2 + $0xd0] sm:$0xff] }
  0x53   :  { %v177_v43 = vld [vmem:[#allocation2 + $0x2a8] sm:$0xff]  ;;  %v3723_v46 = vcombine.high %v172_v39, %v176_v40  ;;  %v164_v47 = vld [vmem:[#allocation2 + $0x240] sm:$0xff]  ;;  %v3722_v52 = vcombine.low %v172_v39, %v176_v40  ;;  %v122_v35 = vld [vmem:[#allocation2 + $0xf0] sm:$0xff]  ;;  %v3678_v39 = vcombine.low %v126_v26, %v130_v27 }
  0x54   :  { %915 = vmatpush1.bf16.msra.mxu0 %v3650_v60  ;;  %956 = vmatpush1.bf16.msra.mxu1 %v3652_v61  ;;  %v168_v48 = vld [vmem:[#allocation2 + $0x260] sm:$0xff]  ;;  %v3725_v49 = vcombine.high %v173_v42, %v177_v43  ;;  %v165_v50 = vld [vmem:[#allocation2 + $0x248] sm:$0xff]  ;;  %v3724_v53 = vcombine.low %v173_v42, %v177_v43  ;;  %v110_v42 = vld [vmem:[#allocation2 + $0x90] sm:$0xff] }
  0x55   :  { %916 = vmatprep.subr.bf16.mxu0 %v3643_v62  ;;  %957 = vmatprep.subr.bf16.mxu1 %v3645_v63  ;;  %v169_v51 = vld [vmem:[#allocation2 + $0x268] sm:$0xff]  ;;  %v3715_v54 = vcombine.high %v164_v47, %v168_v48  ;;  %v156_v55 = vld [vmem:[#allocation2 + $0x200] sm:$0xff]  ;;  %v3714_v61 = vcombine.low %v164_v47, %v168_v48  ;;  %v102_v47 = vld [vmem:[#allocation2 + $0x50] sm:$0xff] }
  0x56   :  { %v160_v56 = vld [vmem:[#allocation2 + $0x220] sm:$0xff]  ;;  %v3717_v58 = vcombine.high %v165_v50, %v169_v51  ;;  %v157_v59 = vld [vmem:[#allocation2 + $0x208] sm:$0xff]  ;;  %v3716_v62 = vcombine.low %v165_v50, %v169_v51  ;;  %v106_v48 = vld [vmem:[#allocation2 + $0x70] sm:$0xff] }
  0x57   :  { %v161_v60 = vld [vmem:[#allocation2 + $0x228] sm:$0xff]  ;;  %v3707_v63 = vcombine.high %v156_v55, %v160_v56  ;;  %v103_v51 = vld [vmem:[#allocation2 + $0x58] sm:$0xff]  ;;  %v194_v26 = vld [vmem:[#allocation2 + $0x330] sm:$0xff] }
  0x58   :  { %917 = vmatpush1.bf16.msra.mxu0 %v3642_v4  ;;  %958 = vmatpush1.bf16.msra.mxu1 %v3644_v5  ;;  %v3709_v2 = vcombine.high %v157_v59, %v161_v60  ;;  %v155_v4 = vld [vmem:[#allocation2 + $0x1f8] sm:$0xff]  ;;  %v3706_v5 = vcombine.low %v156_v55, %v160_v56  ;;  %v94_v55 = vld [vmem:[#allocation2 + $0x10] sm:$0xff] }
  0x59   :  { %918 = vmatprep.subr.bf16.mxu0 %v3763_v6  ;;  %959 = vmatprep.subr.bf16.mxu1 %v3765_v7  ;;  %v88_v6 = vld [vmem:[%s4918_s0] sm:$0xff]  ;;  %v3708_v7 = vcombine.low %v157_v59, %v161_v60  ;;  %v3705_v11 = vcombine.high %v151_v3, %v155_v4  ;;  %v3704_v16 = vcombine.low %v151_v3, %v155_v4  ;;  %v98_v56 = vld [vmem:[#allocation2 + $0x30] sm:$0xff]  ;;  %v95_v60 = vld [vmem:[#allocation2 + $0x18] sm:$0xff] }
  0x5a   :  { %v3655_v59 = vcombine.high %v102_v47, %v106_v48  ;;  %v3647_v3 = vcombine.high %v94_v55, %v98_v56  ;;  %v215_v4 = vld [vmem:[#allocation2 + $0x3d8] sm:$0xff] }
  0x5c   :  { %919 = vmatpush2.bf16.msra.mxu0 %v3762_v12  ;;  %960 = vmatpush2.bf16.msra.mxu1 %v3764_v13  ;;  %v143_v12 = vld [vmem:[#allocation2 + $0x198] sm:$0xff]  ;;  %v4807_v13 = vpack.c.bf16 %v88_v6, %v88_v6 }
  0x5d   :  { %920 = vmatprep.subr.bf16.mxu0 %v3755_v14  ;;  %961 = vmatprep.subr.bf16.mxu1 %v3757_v15  ;;  %v147_v14 = vld [vmem:[#allocation2 + $0x1b8] sm:$0xff]  ;;  %v3702_v15 = vcombine.low %v150_v0, %v154_v1  ;;  %v214_v0 = vld [vmem:[#allocation2 + $0x3d0] sm:$0xff] }
  0x5e   :  { %v3696_v24 = vcombine.low %v143_v12, %v147_v14  ;;  %v218_v1 = vld [vmem:[#allocation2 + $0x3f0] sm:$0xff] }
  0x60   :  { %921 = vmatpush2.bf16.msra.mxu0 %v3754_v20  ;;  %962 = vmatpush2.bf16.msra.mxu1 %v3756_v21  ;;  %v3697_v20 = vcombine.high %v143_v12, %v147_v14  ;;  %v135_v21 = vld [vmem:[#allocation2 + $0x158] sm:$0xff] }
  0x61   :  { %922 = vmatprep.subr.bf16.mxu0 %v3747_v22  ;;  %963 = vmatprep.subr.bf16.mxu1 %v3749_v23  ;;  %v139_v22 = vld [vmem:[#allocation2 + $0x178] sm:$0xff]  ;;  %v3694_v23 = vcombine.low %v142_v9, %v146_v10  ;;  %v210_v9 = vld [vmem:[#allocation2 + $0x3b0] sm:$0xff] }
  0x62   :  { %v3688_v32 = vcombine.low %v135_v21, %v139_v22  ;;  %v207_v12 = vld [vmem:[#allocation2 + $0x398] sm:$0xff] }
  0x63   :  { %v211_v14 = vld [vmem:[#allocation2 + $0x3b8] sm:$0xff] }
  0x64   :  { %923 = vmatpush2.bf16.msra.mxu0 %v3746_v28  ;;  %964 = vmatpush2.bf16.msra.mxu1 %v3748_v29  ;;  %v3689_v28 = vcombine.high %v135_v21, %v139_v22  ;;  %v127_v29 = vld [vmem:[#allocation2 + $0x118] sm:$0xff]  ;;  %v3760_v27 = vcombine.low %v207_v12, %v211_v14 }
  0x65   :  { %924 = vmatprep.subr.bf16.mxu0 %v3739_v30  ;;  %965 = vmatprep.subr.bf16.mxu1 %v3741_v31  ;;  %v131_v30 = vld [vmem:[#allocation2 + $0x138] sm:$0xff]  ;;  %v3686_v31 = vcombine.low %v134_v18, %v138_v19  ;;  %v202_v18 = vld [vmem:[#allocation2 + $0x370] sm:$0xff] }
  0x66   :  { %v3680_v40 = vcombine.low %v127_v29, %v131_v30  ;;  %v199_v21 = vld [vmem:[#allocation2 + $0x358] sm:$0xff] }
  0x67   :  { %v203_v22 = vld [vmem:[#allocation2 + $0x378] sm:$0xff] }
  0x68   :  { %925 = vmatpush2.bf16.msra.mxu0 %v3738_v36  ;;  %966 = vmatpush2.bf16.msra.mxu1 %v3740_v37  ;;  %v3681_v36 = vcombine.high %v127_v29, %v131_v30  ;;  %v119_v37 = vld [vmem:[#allocation2 + $0xd8] sm:$0xff] }
  0x69   :  { %926 = vmatprep.subr.bf16.mxu0 %v3731_v38  ;;  %967 = vmatprep.subr.bf16.mxu1 %v3733_v41  ;;  %v123_v38 = vld [vmem:[#allocation2 + $0xf8] sm:$0xff]  ;;  %v3671_v41 = vcombine.high %v118_v34, %v122_v35 }
  0x6a   :  { %v3673_v43 = vcombine.high %v119_v37, %v123_v38  ;;  %v191_v29 = vld [vmem:[#allocation2 + $0x318] sm:$0xff] }
  0x6b   :  { %v195_v30 = vld [vmem:[#allocation2 + $0x338] sm:$0xff] }
  0x6c   :  { %927 = vmatpush2.bf16.msra.mxu0 %v3730_v44  ;;  %968 = vmatpush2.bf16.msra.mxu1 %v3732_v45  ;;  %v111_v44 = vld [vmem:[#allocation2 + $0x98] sm:$0xff] }
  0x6d   :  { %928 = vmatprep.subr.bf16.mxu0 %v3723_v46  ;;  %969 = vmatprep.subr.bf16.mxu1 %v3725_v49  ;;  %v115_v45 = vld [vmem:[#allocation2 + $0xb8] sm:$0xff]  ;;  %v3670_v46 = vcombine.low %v118_v34, %v122_v35  ;;  %v3672_v49 = vcombine.low %v119_v37, %v123_v38  ;;  %v186_v34 = vld [vmem:[#allocation2 + $0x2f0] sm:$0xff]  ;;  %v3752_v35 = vcombine.low %v199_v21, %v203_v22 }
  0x6e   :  { %v183_v37 = vld [vmem:[#allocation2 + $0x2d8] sm:$0xff] }
  0x6f   :  { %v187_v38 = vld [vmem:[#allocation2 + $0x2f8] sm:$0xff] }
  0x70   :  { %929 = vmatpush2.bf16.msra.mxu0 %v3722_v52  ;;  %970 = vmatpush2.bf16.msra.mxu1 %v3724_v53  ;;  %v107_v52 = vld [vmem:[#allocation2 + $0x78] sm:$0xff]  ;;  %v3665_v53 = vcombine.high %v111_v44, %v115_v45 }
  0x71   :  { %930 = vmatprep.subr.bf16.mxu0 %v3715_v54  ;;  %971 = vmatprep.subr.bf16.mxu1 %v3717_v58  ;;  %v3664_v58 = vcombine.low %v111_v44, %v115_v45  ;;  %v175_v44 = vld [vmem:[#allocation2 + $0x298] sm:$0xff] }
  0x72   :  { %v179_v45 = vld [vmem:[#allocation2 + $0x2b8] sm:$0xff] }
  0x74   :  { %931 = vmatpush2.bf16.msra.mxu0 %v3714_v61  ;;  %972 = vmatpush2.bf16.msra.mxu1 %v3716_v62  ;;  %v99_v61 = vld [vmem:[#allocation2 + $0x38] sm:$0xff]  ;;  %v3657_v62 = vcombine.high %v103_v51, %v107_v52 }
  0x75   :  { %932 = vmatprep.subr.bf16.mxu0 %v3707_v63  ;;  %973 = vmatprep.subr.bf16.mxu1 %v3709_v2  ;;  %v3654_v63 = vcombine.low %v102_v47, %v106_v48  ;;  %v3656_v2 = vcombine.low %v103_v51, %v107_v52  ;;  %v3649_v6 = vcombine.high %v95_v60, %v99_v61  ;;  %v166_v48 = vld [vmem:[#allocation2 + $0x250] sm:$0xff]  ;;  %v167_v52 = vld [vmem:[#allocation2 + $0x258] sm:$0xff] }
  0x76   :  { %v3648_v10 = vcombine.low %v95_v60, %v99_v61  ;;  %v159_v61 = vld [vmem:[#allocation2 + $0x218] sm:$0xff] }
  0x78   :  { %933 = vmatpush2.bf16.msra.mxu0 %v3706_v5  ;;  %974 = vmatpush2.bf16.msra.mxu1 %v3708_v7  ;;  %v219_v5 = vld [vmem:[#allocation2 + $0x3f8] sm:$0xff]  ;;  %v3646_v7 = vcombine.low %v94_v55, %v98_v56  ;;  %v158_v56 = vld [vmem:[#allocation2 + $0x210] sm:$0xff] }
  0x79   :  { %984 = vmatprep.subr.bf16.mxu0 %v3703_v8  ;;  %1025 = vmatprep.subr.bf16.mxu1 %v3705_v11  ;;  %v206_v8 = vld [vmem:[#allocation2 + $0x390] sm:$0xff]  ;;  %v3767_v11 = vcombine.high %v214_v0, %v218_v1  ;;  %v3768_v19 = vcombine.low %v215_v4, %v219_v5 }
  0x7b   :  { %935 = vmatmul.mubr.bf16.vlgmr.msra.gmra.mxu0 %v4807_v13  ;;  %976 = vmatmul.mubr.bf16.vlgmr.msra.gmra.mxu1 %v4807_v13 }
  0x7c   :  { %985 = vmatpush1.bf16.msra.mxu0 %v3702_v15  ;;  %1026 = vmatpush1.bf16.msra.mxu1 %v3704_v16  ;;  %v3769_v15 = vcombine.high %v215_v4, %v219_v5  ;;  %v3766_v16 = vcombine.low %v214_v0, %v218_v1  ;;  %v4143_v4 = vld [vmem:[#allocation4 + $0xe4] ss:$16 sps:$4 sm:$0xff]  }
  0x7d   :  { %986 = vmatprep.subr.bf16.mxu0 %v3695_v17  ;;  %1027 = vmatprep.subr.bf16.mxu1 %v3697_v20  ;;  %v198_v17 = vld [vmem:[#allocation2 + $0x350] sm:$0xff]  ;;  %v3759_v20 = vcombine.high %v206_v8, %v210_v9 }
  0x7e   :  { %1016 = vmatprep.mubr.bf16.mxu0 %v4800_v57  ;;  %1057 = vmatprep.mubr.bf16.mxu1 %v4800_v57  ;;  %v114_v57 = vld [vmem:[#allocation2 + $0xb0] sm:$0xff] }
  0x7f   :  { %v3663_v50 = vcombine.high %v110_v42, %v114_v57  ;;  %v3662_v54 = vcombine.low %v110_v42, %v114_v57  ;;  %v178_v42 = vld [vmem:[#allocation2 + $0x2b0] sm:$0xff]  ;;  %v3744_v57 = vcombine.low %v191_v29, %v195_v30 }
  0x80   :  { %987 = vmatpush1.bf16.msra.mxu0 %v3694_v23  ;;  %1028 = vmatpush1.bf16.msra.mxu1 %v3696_v24  ;;  %v3761_v23 = vcombine.high %v207_v12, %v211_v14  ;;  %v3758_v24 = vcombine.low %v206_v8, %v210_v9  ;;  %v4141_v8 = vld [vmem:[#allocation4 + $0xe0] ss:$16 sps:$4 sm:$0xff]  }
  0x81   :  { %988 = vmatprep.subr.bf16.mxu0 %v3687_v25  ;;  %1029 = vmatprep.subr.bf16.mxu1 %v3689_v28  ;;  %v190_v25 = vld [vmem:[#allocation2 + $0x310] sm:$0xff]  ;;  %v3751_v28 = vcombine.high %v198_v17, %v202_v18 }
  0x82   :  { %v4144_v9 = vld [vmem:[#allocation4 + $0x2e0] ss:$16 sps:$4 sm:$0xff]  }
  0x83   :  { %v4147_v12 = vld [vmem:[#allocation4 + $0xc0] ss:$16 sps:$4 sm:$0xff]  }
  0x84   :  { %989 = vmatpush1.bf16.msra.mxu0 %v3686_v31  ;;  %1030 = vmatpush1.bf16.msra.mxu1 %v3688_v32  ;;  %v3753_v31 = vcombine.high %v199_v21, %v203_v22  ;;  %v3750_v32 = vcombine.low %v198_v17, %v202_v18  ;;  %v4150_v14 = vld [vmem:[#allocation4 + $0x2c0] ss:$16 sps:$4 sm:$0xff]  }
  0x85   :  { %990 = vmatprep.subr.bf16.mxu0 %v3679_v33  ;;  %1031 = vmatprep.subr.bf16.mxu1 %v3681_v36  ;;  %v182_v33 = vld [vmem:[#allocation2 + $0x2d0] sm:$0xff]  ;;  %v3743_v36 = vcombine.high %v190_v25, %v194_v26 }
  0x86   :  { %v3734_v47 = vcombine.low %v182_v33, %v186_v34  ;;  %v4153_v17 = vld [vmem:[#allocation4 + $0xa0] ss:$16 sps:$4 sm:$0xff]  }
  0x87   :  { %v4156_v18 = vld [vmem:[#allocation4 + $0x2a0] ss:$16 sps:$4 sm:$0xff]  }
  0x88   :  { %991 = vmatpush1.bf16.msra.mxu0 %v3678_v39  ;;  %1032 = vmatpush1.bf16.msra.mxu1 %v3680_v40  ;;  %v3745_v39 = vcombine.high %v191_v29, %v195_v30  ;;  %v3742_v40 = vcombine.low %v190_v25, %v194_v26  ;;  %v4159_v21 = vld [vmem:[#allocation4 + $0x80] ss:$16 sps:$4 sm:$0xff]   ;;  %v4173_v26 = vld [vmem:[#allocation4 + $0x44] ss:$16 sps:$4 sm:$0xff]  }
  0x89   :  { %992 = vmatprep.subr.bf16.mxu0 %v3671_v41  ;;  %1033 = vmatprep.subr.bf16.mxu1 %v3673_v43  ;;  %v174_v41 = vld [vmem:[#allocation2 + $0x290] sm:$0xff]  ;;  %v3735_v43 = vcombine.high %v182_v33, %v186_v34 }
  0x8a   :  { %v3727_v51 = vcombine.high %v174_v41, %v178_v42  ;;  %v3726_v55 = vcombine.low %v174_v41, %v178_v42  ;;  %v4162_v22 = vld [vmem:[#allocation4 + $0x280] ss:$16 sps:$4 sm:$0xff]   ;;  %v4179_v30 = vld [vmem:[#allocation4 + $0x24] ss:$16 sps:$4 sm:$0xff]  }
  0x8b   :  { %v4168_v25 = vld [vmem:[#allocation4 + $0x260] ss:$16 sps:$4 sm:$0xff]   ;;  %v4185_v34 = vld [vmem:[#allocation4 + $0x4] ss:$16 sps:$4 sm:$0xff]  }
  0x8c   :  { %993 = vmatpush1.bf16.msra.mxu0 %v3670_v46  ;;  %1034 = vmatpush1.bf16.msra.mxu1 %v3672_v49  ;;  %v3737_v46 = vcombine.high %v183_v37, %v187_v38  ;;  %v170_v49 = vld [vmem:[#allocation2 + $0x270] sm:$0xff] }
  0x8d   :  { %994 = vmatprep.subr.bf16.mxu0 %v3663_v50  ;;  %1035 = vmatprep.subr.bf16.mxu1 %v3665_v53  ;;  %v3736_v50 = vcombine.low %v183_v37, %v187_v38  ;;  %v171_v53 = vld [vmem:[#allocation2 + $0x278] sm:$0xff]  ;;  %v3719_v60 = vcombine.high %v166_v48, %v170_v49  ;;  %v3718_v0 = vcombine.low %v166_v48, %v170_v49  ;;  %v4174_v29 = vld [vmem:[#allocation4 + $0x240] ss:$16 sps:$4 sm:$0xff]   ;;  %v4191_v38 = vld [vmem:[#allocation4 + $0x1e4] ss:$16 sps:$4 sm:$0xff]  }
  0x8e   :  { %v3720_v1 = vcombine.low %v167_v52, %v171_v53  ;;  %v4180_v33 = vld [vmem:[#allocation4 + $0x220] ss:$16 sps:$4 sm:$0xff]   ;;  %v4197_v42 = vld [vmem:[#allocation4 + $0x1c4] ss:$16 sps:$4 sm:$0xff]  }
  0x8f   :  { %v4186_v37 = vld [vmem:[#allocation4 + $0x200] ss:$16 sps:$4 sm:$0xff]   ;;  %v4209_v49 = vld [vmem:[#allocation4 + $0x184] ss:$16 sps:$4 sm:$0xff]  }
  0x90   :  { %995 = vmatpush1.bf16.msra.mxu0 %v3662_v54  ;;  %1036 = vmatpush1.bf16.msra.mxu1 %v3664_v58  ;;  %v3729_v54 = vcombine.high %v175_v44, %v179_v45  ;;  %v162_v58 = vld [vmem:[#allocation2 + $0x230] sm:$0xff] }
  0x91   :  { %996 = vmatprep.subr.bf16.mxu0 %v3655_v59  ;;  %1037 = vmatprep.subr.bf16.mxu1 %v3657_v62  ;;  %v3728_v59 = vcombine.low %v175_v44, %v179_v45  ;;  %v163_v62 = vld [vmem:[#allocation2 + $0x238] sm:$0xff]  ;;  %v3710_v5 = vcombine.low %v158_v56, %v162_v58  ;;  %v4192_v41 = vld [vmem:[#allocation4 + $0x3e0] ss:$16 sps:$4 sm:$0xff]   ;;  %v4203_v45 = vld [vmem:[#allocation4 + $0x1a4] ss:$16 sps:$4 sm:$0xff]  }
  0x92   :  { %v4198_v44 = vld [vmem:[#allocation4 + $0x3c0] ss:$16 sps:$4 sm:$0xff]  }
  0x93   :  { %v4204_v48 = vld [vmem:[#allocation4 + $0x3a0] ss:$16 sps:$4 sm:$0xff]  }
  0x94   :  { %997 = vmatpush1.bf16.msra.mxu0 %v3654_v63  ;;  %1038 = vmatpush1.bf16.msra.mxu1 %v3656_v2  ;;  %v3721_v63 = vcombine.high %v167_v52, %v171_v53  ;;  %v3711_v2 = vcombine.high %v158_v56, %v162_v58  ;;  %v4210_v52 = vld [vmem:[#allocation4 + $0x380] ss:$16 sps:$4 sm:$0xff]   ;;  %v4215_v53 = vld [vmem:[#allocation4 + $0x164] ss:$16 sps:$4 sm:$0xff]  }
  0x95   :  { %998 = vmatprep.subr.bf16.mxu0 %v3647_v3  ;;  %1039 = vmatprep.subr.bf16.mxu1 %v3649_v6  ;;  %v3713_v3 = vcombine.high %v159_v61, %v163_v62  ;;  %v4146_v6 = vld [vmem:[#allocation4 + $0x2e4] ss:$16 sps:$4 sm:$0xff]   ;;  %v4216_v56 = vld [vmem:[#allocation4 + $0x360] ss:$16 sps:$4 sm:$0xff]  }
  0x96   :  { %v4221_v58 = vld [vmem:[#allocation4 + $0x144] ss:$16 sps:$4 sm:$0xff]  }
  0x98   :  { %999 = vmatpush1.bf16.msra.mxu0 %v3646_v7  ;;  %1040 = vmatpush1.bf16.msra.mxu1 %v3648_v10  ;;  %v3712_v7 = vcombine.low %v159_v61, %v163_v62  ;;  %v4149_v10 = vld [vmem:[#allocation4 + $0xc4] ss:$16 sps:$4 sm:$0xff]   ;;  %v4222_v61 = vld [vmem:[#allocation4 + $0x340] ss:$16 sps:$4 sm:$0xff]  }
  0x99   :  { %1000 = vmatprep.subr.bf16.mxu0 %v3767_v11  ;;  %1041 = vmatprep.subr.bf16.mxu1 %v3769_v15  ;;  %v4152_v11 = vld [vmem:[#allocation4 + $0x2c4] ss:$16 sps:$4 sm:$0xff]  }
  0x9a   :  { %v4155_v15 = vld [vmem:[#allocation4 + $0xa4] ss:$16 sps:$4 sm:$0xff]  }
  0x9b   :  { %v4227_v62 = vld [vmem:[#allocation4 + $0x124] ss:$16 sps:$4 sm:$0xff]  }
  0x9c   :  { %1001 = vmatpush2.bf16.msra.mxu0 %v3766_v16  ;;  %1042 = vmatpush2.bf16.msra.mxu1 %v3768_v19  ;;  %v4158_v16 = vld [vmem:[#allocation4 + $0x2a4] ss:$16 sps:$4 sm:$0xff]  }
  0x9d   :  { %1002 = vmatprep.subr.bf16.mxu0 %v3759_v20  ;;  %1043 = vmatprep.subr.bf16.mxu1 %v3761_v23  ;;  %v4161_v19 = vld [vmem:[#allocation4 + $0x84] ss:$16 sps:$4 sm:$0xff]  }
  0x9e   :  { %v4164_v20 = vld [vmem:[#allocation4 + $0x284] ss:$16 sps:$4 sm:$0xff]  }
  0x9f   :  { %v4167_v23 = vld [vmem:[#allocation4 + $0x64] ss:$16 sps:$4 sm:$0xff]  }
  0xa0   :  { %1003 = vmatpush2.bf16.msra.mxu0 %v3758_v24  ;;  %1044 = vmatpush2.bf16.msra.mxu1 %v3760_v27  ;;  %v4170_v24 = vld [vmem:[#allocation4 + $0x264] ss:$16 sps:$4 sm:$0xff]  }
  0xa1   :  { %1004 = vmatprep.subr.bf16.mxu0 %v3751_v28  ;;  %1045 = vmatprep.subr.bf16.mxu1 %v3753_v31  ;;  %v4176_v27 = vld [vmem:[#allocation4 + $0x244] ss:$16 sps:$4 sm:$0xff]   ;;  %v4171_v28 = vld [vmem:[#allocation4 + $0x40] ss:$16 sps:$4 sm:$0xff]  }
  0xa2   :  { %v4182_v31 = vld [vmem:[#allocation4 + $0x224] ss:$16 sps:$4 sm:$0xff]  }
  0xa4   :  { %1005 = vmatpush2.bf16.msra.mxu0 %v3750_v32  ;;  %1046 = vmatpush2.bf16.msra.mxu1 %v3752_v35  ;;  %v4177_v32 = vld [vmem:[#allocation4 + $0x20] ss:$16 sps:$4 sm:$0xff]   ;;  %v4188_v35 = vld [vmem:[#allocation4 + $0x204] ss:$16 sps:$4 sm:$0xff]  }
  0xa5   :  { %1006 = vmatprep.subr.bf16.mxu0 %v3743_v36  ;;  %1047 = vmatprep.subr.bf16.mxu1 %v3745_v39  ;;  %v4183_v36 = vld [vmem:[#allocation4] ss:$16 sps:$4 sm:$0xff]   ;;  %v4194_v39 = vld [vmem:[#allocation4 + $0x3e4] ss:$16 sps:$4 sm:$0xff]  }
  0xa8   :  { %1007 = vmatpush2.bf16.msra.mxu0 %v3742_v40  ;;  %1048 = vmatpush2.bf16.msra.mxu1 %v3744_v57  ;;  %v4189_v40 = vld [vmem:[#allocation4 + $0x1e0] ss:$16 sps:$4 sm:$0xff]   ;;  %v4200_v57 = vld [vmem:[#allocation4 + $0x3c4] ss:$16 sps:$4 sm:$0xff]  }
  0xa9   :  { %1008 = vmatprep.subr.bf16.mxu0 %v3735_v43  ;;  %1049 = vmatprep.subr.bf16.mxu1 %v3737_v46  ;;  %v4195_v43 = vld [vmem:[#allocation4 + $0x1c0] ss:$16 sps:$4 sm:$0xff]   ;;  %v4206_v46 = vld [vmem:[#allocation4 + $0x3a4] ss:$16 sps:$4 sm:$0xff]  }
  0xac   :  { %1009 = vmatpush2.bf16.msra.mxu0 %v3734_v47  ;;  %1050 = vmatpush2.bf16.msra.mxu1 %v3736_v50  ;;  %v4201_v47 = vld [vmem:[#allocation4 + $0x1a0] ss:$16 sps:$4 sm:$0xff]   ;;  %v4212_v50 = vld [vmem:[#allocation4 + $0x384] ss:$16 sps:$4 sm:$0xff]  }
  0xad   :  { %1010 = vmatprep.subr.bf16.mxu0 %v3727_v51  ;;  %1051 = vmatprep.subr.bf16.mxu1 %v3729_v54  ;;  %v4207_v51 = vld [vmem:[#allocation4 + $0x180] ss:$16 sps:$4 sm:$0xff]   ;;  %v4218_v54 = vld [vmem:[#allocation4 + $0x364] ss:$16 sps:$4 sm:$0xff]  }
  0xb0   :  { %1011 = vmatpush2.bf16.msra.mxu0 %v3726_v55  ;;  %1052 = vmatpush2.bf16.msra.mxu1 %v3728_v59  ;;  %v4213_v55 = vld [vmem:[#allocation4 + $0x160] ss:$16 sps:$4 sm:$0xff]   ;;  %v4224_v59 = vld [vmem:[#allocation4 + $0x344] ss:$16 sps:$4 sm:$0xff]  }
  0xb1   :  { %1012 = vmatprep.subr.bf16.mxu0 %v3719_v60  ;;  %1053 = vmatprep.subr.bf16.mxu1 %v3721_v63  ;;  %v4219_v60 = vld [vmem:[#allocation4 + $0x140] ss:$16 sps:$4 sm:$0xff]   ;;  %v4230_v63 = vld [vmem:[#allocation4 + $0x324] ss:$16 sps:$4 sm:$0xff]  }
  0xb4   :  { %1013 = vmatpush2.bf16.msra.mxu0 %v3718_v0  ;;  %1054 = vmatpush2.bf16.msra.mxu1 %v3720_v1  ;;  %v4225_v0 = vld [vmem:[#allocation4 + $0x120] ss:$16 sps:$4 sm:$0xff]  }
  0xb5   :  { %1014 = vmatprep.subr.bf16.mxu0 %v3711_v2  ;;  %1055 = vmatprep.subr.bf16.mxu1 %v3713_v3  ;;  %v4228_v1 = vld [vmem:[#allocation4 + $0x320] ss:$16 sps:$4 sm:$0xff]   ;;  %v4233_v2 = vld [vmem:[#allocation4 + $0x104] ss:$16 sps:$4 sm:$0xff]  }
  0xb6   :  { %v4236_v3 = vld [vmem:[#allocation4 + $0x304] ss:$16 sps:$4 sm:$0xff]  }
  0xb8   :  { %1015 = vmatpush2.bf16.msra.mxu0 %v3710_v5  ;;  %1056 = vmatpush2.bf16.msra.mxu1 %v3712_v7  ;;  %v4234_v5 = vld [vmem:[#allocation4 + $0x300] ss:$16 sps:$4 sm:$0xff]   ;;  %v4242_v7 = vld [vmem:[#allocation4 + $0x6e4] ss:$16 sps:$4 sm:$0xff]  }
  0xb9   :  { %2640 = vmatprep.subr.bf16.mxu0 %v4143_v4  ;;  %2681 = vmatprep.subr.bf16.mxu1 %v4146_v6  ;;  %v4231_v4 = vld [vmem:[#allocation4 + $0x100] ss:$16 sps:$4 sm:$0xff]   ;;  %v4239_v6 = vld [vmem:[#allocation4 + $0x4e4] ss:$16 sps:$4 sm:$0xff]  }
  0xbb   :  { %1017 = vmatmul.mubr.bf16.vlgmr.msra.gmra.mxu0 %v4807_v13  ;;  %1058 = vmatmul.mubr.bf16.vlgmr.msra.gmra.mxu1 %v4807_v13  ;;  %v4165_v13 = vld [vmem:[#allocation4 + $0x60] ss:$16 sps:$4 sm:$0xff]  }
  0xbc   :  { %2641 = vmatpush1.bf16.msra.mxu0 %v4141_v8  ;;  %2682 = vmatpush1.bf16.msra.mxu1 %v4144_v9  ;;  %v222_v8 = vlaneseq }
  0xbd   :  { %2642 = vmatprep.subr.bf16.mxu0 %v4149_v10  ;;  %2683 = vmatprep.subr.bf16.mxu1 %v4152_v11  ;;  %v4823_v11 = vld [vmem:[%s4920_s2] sm:$0xff] }
  0xbe   :  { %v4815_v9 = vshrl.u32 %v222_v8, 7  ;;  %v4288_v8 = vld [vmem:[#allocation4 + $0x7e0] ss:$16 sps:$4 sm:$0xff]  }
  0xc0   :  { %2643 = vmatpush1.bf16.msra.mxu0 %v4147_v12  ;;  %2684 = vmatpush1.bf16.msra.mxu1 %v4150_v14  ;;  %v4818_v10 = vsub.s32 0, %v4815_v9  ;;  %v232_v12 = vsub.s32 2, %v4815_v9  ;;  %v4827_v14 = vsub.s32 1, %v4815_v9 }
  0xc1   :  { %2644 = vmatprep.subr.bf16.mxu0 %v4155_v15  ;;  %2685 = vmatprep.subr.bf16.mxu1 %v4158_v16  ;;  %v236_v15 = vsub.s32 3, %v4815_v9 }
  0xc2   :  { %v225_v16 = vrot.slane %v4823_v11, %v4818_v10 }
  0xc4   :  { %2645 = vmatpush1.bf16.msra.mxu0 %v4153_v17  ;;  %2686 = vmatpush1.bf16.msra.mxu1 %v4156_v18  ;;  %v233_v17 = vrot.slane %v4823_v11, %v232_v12  ;;  %v229_v18 = vrot.slane %v4823_v11, %v4827_v14 }
  0xc5   :  { %2646 = vmatprep.subr.bf16.mxu0 %v4161_v19  ;;  %2687 = vmatprep.subr.bf16.mxu1 %v4164_v20  ;;  %v237_v20 = vrot.slane %v4823_v11, %v236_v15 }
  0xc8   :  { %2647 = vmatpush1.bf16.msra.mxu0 %v4159_v21  ;;  %2688 = vmatpush1.bf16.msra.mxu1 %v4162_v22 }
  0xc9   :  { %2648 = vmatprep.subr.bf16.mxu0 %v4167_v23  ;;  %2689 = vmatprep.subr.bf16.mxu1 %v4170_v24 }
  0xcc   :  { %2649 = vmatpush1.bf16.msra.mxu0 %v4165_v13  ;;  %2690 = vmatpush1.bf16.msra.mxu1 %v4168_v25 }
  0xcd   :  { %2650 = vmatprep.subr.bf16.mxu0 %v4173_v26  ;;  %2691 = vmatprep.subr.bf16.mxu1 %v4176_v27 }
  0xd0   :  { %2651 = vmatpush1.bf16.msra.mxu0 %v4171_v28  ;;  %2692 = vmatpush1.bf16.msra.mxu1 %v4174_v29 }
  0xd1   :  { %2652 = vmatprep.subr.bf16.mxu0 %v4179_v30  ;;  %2693 = vmatprep.subr.bf16.mxu1 %v4182_v31 }
  0xd4   :  { %2653 = vmatpush1.bf16.msra.mxu0 %v4177_v32  ;;  %2694 = vmatpush1.bf16.msra.mxu1 %v4180_v33 }
  0xd5   :  { %2654 = vmatprep.subr.bf16.mxu0 %v4185_v34  ;;  %2695 = vmatprep.subr.bf16.mxu1 %v4188_v35 }
  0xd8   :  { %2655 = vmatpush1.bf16.msra.mxu0 %v4183_v36  ;;  %2696 = vmatpush1.bf16.msra.mxu1 %v4186_v37  ;;  %v4237_v37 = vld [vmem:[#allocation4 + $0x4e0] ss:$16 sps:$4 sm:$0xff]  }
  0xd9   :  { %2656 = vmatprep.subr.bf16.mxu0 %v4191_v38  ;;  %2697 = vmatprep.subr.bf16.mxu1 %v4194_v39 }
  0xdc   :  { %2657 = vmatpush2.bf16.msra.mxu0 %v4189_v40  ;;  %2698 = vmatpush2.bf16.msra.mxu1 %v4192_v41  ;;  %v4240_v40 = vld [vmem:[#allocation4 + $0x6e0] ss:$16 sps:$4 sm:$0xff]   ;;  %v4245_v41 = vld [vmem:[#allocation4 + $0x4c4] ss:$16 sps:$4 sm:$0xff]  }
  0xdd   :  { %2658 = vmatprep.subr.bf16.mxu0 %v4197_v42  ;;  %2699 = vmatprep.subr.bf16.mxu1 %v4200_v57  ;;  %v4248_v42 = vld [vmem:[#allocation4 + $0x6c4] ss:$16 sps:$4 sm:$0xff]   ;;  %v4243_v57 = vld [vmem:[#allocation4 + $0x4c0] ss:$16 sps:$4 sm:$0xff]  }
  0xe0   :  { %2659 = vmatpush2.bf16.msra.mxu0 %v4195_v43  ;;  %2700 = vmatpush2.bf16.msra.mxu1 %v4198_v44  ;;  %v4246_v43 = vld [vmem:[#allocation4 + $0x6c0] ss:$16 sps:$4 sm:$0xff]   ;;  %v4251_v44 = vld [vmem:[#allocation4 + $0x4a4] ss:$16 sps:$4 sm:$0xff]  }
  0xe1   :  { %2660 = vmatprep.subr.bf16.mxu0 %v4203_v45  ;;  %2701 = vmatprep.subr.bf16.mxu1 %v4206_v46  ;;  %v4254_v45 = vld [vmem:[#allocation4 + $0x6a4] ss:$16 sps:$4 sm:$0xff]   ;;  %v4249_v46 = vld [vmem:[#allocation4 + $0x4a0] ss:$16 sps:$4 sm:$0xff]  }
  0xe4   :  { %2661 = vmatpush2.bf16.msra.mxu0 %v4201_v47  ;;  %2702 = vmatpush2.bf16.msra.mxu1 %v4204_v48  ;;  %v4252_v47 = vld [vmem:[#allocation4 + $0x6a0] ss:$16 sps:$4 sm:$0xff]   ;;  %v4257_v48 = vld [vmem:[#allocation4 + $0x484] ss:$16 sps:$4 sm:$0xff]  }
  0xe5   :  { %2662 = vmatprep.subr.bf16.mxu0 %v4209_v49  ;;  %2703 = vmatprep.subr.bf16.mxu1 %v4212_v50  ;;  %v4260_v49 = vld [vmem:[#allocation4 + $0x684] ss:$16 sps:$4 sm:$0xff]   ;;  %v4255_v50 = vld [vmem:[#allocation4 + $0x480] ss:$16 sps:$4 sm:$0xff]  }
  0xe8   :  { %2663 = vmatpush2.bf16.msra.mxu0 %v4207_v51  ;;  %2704 = vmatpush2.bf16.msra.mxu1 %v4210_v52  ;;  %v4258_v51 = vld [vmem:[#allocation4 + $0x680] ss:$16 sps:$4 sm:$0xff]   ;;  %v4263_v52 = vld [vmem:[#allocation4 + $0x464] ss:$16 sps:$4 sm:$0xff]  }
  0xe9   :  { %2664 = vmatprep.subr.bf16.mxu0 %v4215_v53  ;;  %2705 = vmatprep.subr.bf16.mxu1 %v4218_v54  ;;  %v4266_v53 = vld [vmem:[#allocation4 + $0x664] ss:$16 sps:$4 sm:$0xff]   ;;  %v4261_v54 = vld [vmem:[#allocation4 + $0x460] ss:$16 sps:$4 sm:$0xff]  }
  0xec   :  { %2665 = vmatpush2.bf16.msra.mxu0 %v4213_v55  ;;  %2706 = vmatpush2.bf16.msra.mxu1 %v4216_v56  ;;  %v4264_v55 = vld [vmem:[#allocation4 + $0x660] ss:$16 sps:$4 sm:$0xff]   ;;  %v4269_v56 = vld [vmem:[#allocation4 + $0x444] ss:$16 sps:$4 sm:$0xff]  }
  0xed   :  { %2666 = vmatprep.subr.bf16.mxu0 %v4221_v58  ;;  %2707 = vmatprep.subr.bf16.mxu1 %v4224_v59  ;;  %v4272_v58 = vld [vmem:[#allocation4 + $0x644] ss:$16 sps:$4 sm:$0xff]   ;;  %v4267_v59 = vld [vmem:[#allocation4 + $0x440] ss:$16 sps:$4 sm:$0xff]  }
  0xf0   :  { %2667 = vmatpush2.bf16.msra.mxu0 %v4219_v60  ;;  %2708 = vmatpush2.bf16.msra.mxu1 %v4222_v61  ;;  %v4270_v60 = vld [vmem:[#allocation4 + $0x640] ss:$16 sps:$4 sm:$0xff]   ;;  %v4275_v61 = vld [vmem:[#allocation4 + $0x424] ss:$16 sps:$4 sm:$0xff]  }
  0xf1   :  { %2668 = vmatprep.subr.bf16.mxu0 %v4227_v62  ;;  %2709 = vmatprep.subr.bf16.mxu1 %v4230_v63  ;;  %v4278_v62 = vld [vmem:[#allocation4 + $0x624] ss:$16 sps:$4 sm:$0xff]   ;;  %v4273_v63 = vld [vmem:[#allocation4 + $0x420] ss:$16 sps:$4 sm:$0xff]  }
  0xf4   :  { %2669 = vmatpush2.bf16.msra.mxu0 %v4225_v0  ;;  %2710 = vmatpush2.bf16.msra.mxu1 %v4228_v1  ;;  %v4276_v0 = vld [vmem:[#allocation4 + $0x620] ss:$16 sps:$4 sm:$0xff]   ;;  %v4281_v1 = vld [vmem:[#allocation4 + $0x404] ss:$16 sps:$4 sm:$0xff]  }
  0xf5   :  { %2670 = vmatprep.subr.bf16.mxu0 %v4233_v2  ;;  %2711 = vmatprep.subr.bf16.mxu1 %v4236_v3  ;;  %v4284_v2 = vld [vmem:[#allocation4 + $0x604] ss:$16 sps:$4 sm:$0xff]   ;;  %v4279_v3 = vld [vmem:[#allocation4 + $0x400] ss:$16 sps:$4 sm:$0xff]  }
  0xf8   :  { %2671 = vmatpush2.bf16.msra.mxu0 %v4231_v4  ;;  %2712 = vmatpush2.bf16.msra.mxu1 %v4234_v5  ;;  %v4282_v4 = vld [vmem:[#allocation4 + $0x600] ss:$16 sps:$4 sm:$0xff]   ;;  %v4287_v5 = vld [vmem:[#allocation4 + $0x5e4] ss:$16 sps:$4 sm:$0xff]  }
  0xf9   :  { %2722 = vmatprep.subr.bf16.mxu0 %v4239_v6  ;;  %2763 = vmatprep.subr.bf16.mxu1 %v4242_v7  ;;  %v4290_v6 = vld [vmem:[#allocation4 + $0x7e4] ss:$16 sps:$4 sm:$0xff]   ;;  %v4285_v7 = vld [vmem:[#allocation4 + $0x5e0] ss:$16 sps:$4 sm:$0xff]  }
 0x13b   :  { %v936_v19 = vpop.f32.mrf.mxu0  ;;  %v977_v22 = vpop.f32.mrf.mxu1 }
 0x13c   :  { %v937_v21 = vadd.f32 %v936_v19, %v225_v16  ;;  %v978_v23 = vadd.f32 %v977_v22, %v233_v17  ;;  %v4293_v16 = vld [vmem:[#allocation4 + $0x5c4] ss:$16 sps:$4 sm:$0xff]   ;;  %v4294_v19 = vld [vmem:[#allocation4 + $0x7c0] ss:$16 sps:$4 sm:$0xff]  }
 0x13d   :  { %v938_v24 = vpop.f32.mrf.mxu0  ;;  %v979_v25 = vpop.f32.mrf.mxu1  ;;  %v4296_v17 = vld [vmem:[#allocation4 + $0x7c4] ss:$16 sps:$4 sm:$0xff]   ;;  %v4297_v22 = vld [vmem:[#allocation4 + $0x5a0] ss:$16 sps:$4 sm:$0xff]  }
 0x13e   :  { %v939_v13 = vadd.f32 %v938_v24, %v229_v18  ;;  %v1066_v26 = vmax.f32 %v937_v21, 0.0  ;;  %v1068_v27 = vmax.f32 %v978_v23, 0.0  ;;  %v980_v28 = vadd.f32 %v979_v25, %v237_v20  ;;  %v4291_v18 = vld [vmem:[#allocation4 + $0x5c0] ss:$16 sps:$4 sm:$0xff]   ;;  %v4299_v20 = vld [vmem:[#allocation4 + $0x5a4] ss:$16 sps:$4 sm:$0xff]  }
 0x13f   :  { %v940_v29 = vpop.f32.mrf.mxu0  ;;  %v981_v31 = vpop.f32.mrf.mxu1  ;;  %v4302_v21 = vld [vmem:[#allocation4 + $0x7a4] ss:$16 sps:$4 sm:$0xff]   ;;  %v4300_v23 = vld [vmem:[#allocation4 + $0x7a0] ss:$16 sps:$4 sm:$0xff]  }
 0x140   :  { %v1067_v30 = vmax.f32 %v939_v13, 0.0  ;;  %v1069_v32 = vmax.f32 %v980_v28, 0.0  ;;  %v4840_v34 = vpack.c.bf16 %v1068_v27, %v1068_v27  ;;  %v4844_v38 = vpack.c.bf16 %v1066_v26, %v1066_v26  ;;  %v4305_v24 = vld [vmem:[#allocation4 + $0x584] ss:$16 sps:$4 sm:$0xff]   ;;  %v4303_v25 = vld [vmem:[#allocation4 + $0x580] ss:$16 sps:$4 sm:$0xff]  }
 0x141   :  { %v941_v33 = vpop.f32.mrf.mxu0  ;;  %v982_v36 = vpop.f32.mrf.mxu1  ;;  %v4308_v13 = vld [vmem:[#allocation4 + $0x784] ss:$16 sps:$4 sm:$0xff]   ;;  %v4306_v26 = vld [vmem:[#allocation4 + $0x780] ss:$16 sps:$4 sm:$0xff]  }
 0x142   :  { %v4842_v35 = vpack.c.bf16 %v1067_v30, %v1067_v30  ;;  %v4846_v39 = vpack.c.bf16 %v1069_v32, %v1069_v32  ;;  %v4311_v27 = vld [vmem:[#allocation4 + $0x564] ss:$16 sps:$4 sm:$0xff]   ;;  %v4309_v29 = vld [vmem:[#allocation4 + $0x560] ss:$16 sps:$4 sm:$0xff]   ;;  %v240_v33 = vsub.s32 4, %v4815_v9  ;;  %v248_v36 = vsub.s32 6, %v4815_v9 }
 0x143   :  { %v4314_v28 = vld [vmem:[#allocation4 + $0x764] ss:$16 sps:$4 sm:$0xff]   ;;  %v4312_v30 = vld [vmem:[#allocation4 + $0x760] ss:$16 sps:$4 sm:$0xff]  }
 0x144   :  { %2672 = vmatprep.mubr.bf16.mxu0 %v4842_v35  ;;  %2713 = vmatprep.mubr.bf16.mxu1 %v4846_v39  ;;  %v4317_v31 = vld [vmem:[#allocation4 + $0x544] ss:$16 sps:$4 sm:$0xff]  }
 0x145   :  { %2673 = vmatmul.mubr.bf16.vlgmr.msra.gmra.mxu0 %v4844_v38  ;;  %2714 = vmatmul.mubr.bf16.vlgmr.msra.gmra.mxu1 %v4840_v34  ;;  %v4320_v32 = vld [vmem:[#allocation4 + $0x744] ss:$16 sps:$4 sm:$0xff]  }
 0x146   :  { %2723 = vmatpush1.bf16.msra.mxu0 %v4237_v37  ;;  %2764 = vmatpush1.bf16.msra.mxu1 %v4240_v40  ;;  %v4315_v37 = vld [vmem:[#allocation4 + $0x540] ss:$16 sps:$4 sm:$0xff]   ;;  %v244_v40 = vsub.s32 5, %v4815_v9 }
 0x147   :  { %2724 = vmatprep.subr.bf16.mxu0 %v4245_v41  ;;  %2765 = vmatprep.subr.bf16.mxu1 %v4248_v42  ;;  %v4318_v41 = vld [vmem:[#allocation4 + $0x740] ss:$16 sps:$4 sm:$0xff]   ;;  %v4323_v42 = vld [vmem:[#allocation4 + $0x524] ss:$16 sps:$4 sm:$0xff]  }
 0x14a   :  { %2725 = vmatpush1.bf16.msra.mxu0 %v4243_v57  ;;  %2766 = vmatpush1.bf16.msra.mxu1 %v4246_v43  ;;  %v252_v57 = vsub.s32 7, %v4815_v9  ;;  %v241_v43 = vrot.slane %v4823_v11, %v240_v33  ;;  %v4360_v33 = vld [vmem:[#allocation4 + $0x268] ss:$16 sps:$4 sm:$0xff]  }
 0x14b   :  { %2726 = vmatprep.subr.bf16.mxu0 %v4251_v44  ;;  %2767 = vmatprep.subr.bf16.mxu1 %v4254_v45  ;;  %v4326_v44 = vld [vmem:[#allocation4 + $0x724] ss:$16 sps:$4 sm:$0xff]   ;;  %v249_v45 = vrot.slane %v4823_v11, %v248_v36  ;;  %v4365_v36 = vld [vmem:[#allocation4 + $0x4c] ss:$16 sps:$4 sm:$0xff]  }
 0x14e   :  { %2727 = vmatpush1.bf16.msra.mxu0 %v4249_v46  ;;  %2768 = vmatpush1.bf16.msra.mxu1 %v4252_v47  ;;  %v4321_v46 = vld [vmem:[#allocation4 + $0x520] ss:$16 sps:$4 sm:$0xff]   ;;  %v245_v47 = vrot.slane %v4823_v11, %v244_v40  ;;  %v4363_v40 = vld [vmem:[#allocation4 + $0x48] ss:$16 sps:$4 sm:$0xff]  }
 0x14f   :  { %2728 = vmatprep.subr.bf16.mxu0 %v4257_v48  ;;  %2769 = vmatprep.subr.bf16.mxu1 %v4260_v49  ;;  %v4324_v49 = vld [vmem:[#allocation4 + $0x720] ss:$16 sps:$4 sm:$0xff]  }
 0x152   :  { %2729 = vmatpush1.bf16.msra.mxu0 %v4255_v50  ;;  %2770 = vmatpush1.bf16.msra.mxu1 %v4258_v51  ;;  %v253_v50 = vrot.slane %v4823_v11, %v252_v57  ;;  %v4329_v51 = vld [vmem:[#allocation4 + $0x504] ss:$16 sps:$4 sm:$0xff]   ;;  %v4374_v57 = vld [vmem:[#allocation4 + $0x22c] ss:$16 sps:$4 sm:$0xff]  }
 0x153   :  { %2730 = vmatprep.subr.bf16.mxu0 %v4263_v52  ;;  %2771 = vmatprep.subr.bf16.mxu1 %v4266_v53 }
 0x156   :  { %2731 = vmatpush1.bf16.msra.mxu0 %v4261_v54  ;;  %2772 = vmatpush1.bf16.msra.mxu1 %v4264_v55  ;;  %v4332_v54 = vld [vmem:[#allocation4 + $0x704] ss:$16 sps:$4 sm:$0xff]  }
 0x157   :  { %2732 = vmatprep.subr.bf16.mxu0 %v4269_v56  ;;  %2773 = vmatprep.subr.bf16.mxu1 %v4272_v58 }
 0x15a   :  { %2733 = vmatpush1.bf16.msra.mxu0 %v4267_v59  ;;  %2774 = vmatpush1.bf16.msra.mxu1 %v4270_v60  ;;  %v4327_v60 = vld [vmem:[#allocation4 + $0x500] ss:$16 sps:$4 sm:$0xff]  }
 0x15b   :  { %2734 = vmatprep.subr.bf16.mxu0 %v4275_v61  ;;  %2775 = vmatprep.subr.bf16.mxu1 %v4278_v62 }
 0x15e   :  { %2735 = vmatpush1.bf16.msra.mxu0 %v4273_v63  ;;  %2776 = vmatpush1.bf16.msra.mxu1 %v4276_v0 }
 0x15f   :  { %2736 = vmatprep.subr.bf16.mxu0 %v4281_v1  ;;  %2777 = vmatprep.subr.bf16.mxu1 %v4284_v2  ;;  %v4330_v1 = vld [vmem:[#allocation4 + $0x700] ss:$16 sps:$4 sm:$0xff]   ;;  %v4335_v2 = vld [vmem:[#allocation4 + $0xec] ss:$16 sps:$4 sm:$0xff]  }
 0x162   :  { %2737 = vmatpush1.bf16.msra.mxu0 %v4279_v3  ;;  %2778 = vmatpush1.bf16.msra.mxu1 %v4282_v4  ;;  %v4338_v4 = vld [vmem:[#allocation4 + $0x2ec] ss:$16 sps:$4 sm:$0xff]  }
 0x163   :  { %2738 = vmatprep.subr.bf16.mxu0 %v4287_v5  ;;  %2779 = vmatprep.subr.bf16.mxu1 %v4290_v6 }
 0x166   :  { %2739 = vmatpush2.bf16.msra.mxu0 %v4285_v7  ;;  %2780 = vmatpush2.bf16.msra.mxu1 %v4288_v8 }
 0x167   :  { %2740 = vmatprep.subr.bf16.mxu0 %v4293_v16  ;;  %2781 = vmatprep.subr.bf16.mxu1 %v4296_v17  ;;  %v4333_v17 = vld [vmem:[#allocation4 + $0xe8] ss:$16 sps:$4 sm:$0xff]  }
 0x16a   :  { %2741 = vmatpush2.bf16.msra.mxu0 %v4291_v18  ;;  %2782 = vmatpush2.bf16.msra.mxu1 %v4294_v19 }
 0x16b   :  { %2742 = vmatprep.subr.bf16.mxu0 %v4299_v20  ;;  %2783 = vmatprep.subr.bf16.mxu1 %v4302_v21  ;;  %v4336_v20 = vld [vmem:[#allocation4 + $0x2e8] ss:$16 sps:$4 sm:$0xff]   ;;  %v4341_v21 = vld [vmem:[#allocation4 + $0xcc] ss:$16 sps:$4 sm:$0xff]  }
 0x16e   :  { %2743 = vmatpush2.bf16.msra.mxu0 %v4297_v22  ;;  %2784 = vmatpush2.bf16.msra.mxu1 %v4300_v23  ;;  %v4344_v22 = vld [vmem:[#allocation4 + $0x2cc] ss:$16 sps:$4 sm:$0xff]   ;;  %v4339_v23 = vld [vmem:[#allocation4 + $0xc8] ss:$16 sps:$4 sm:$0xff]  }
 0x16f   :  { %2744 = vmatprep.subr.bf16.mxu0 %v4305_v24  ;;  %2785 = vmatprep.subr.bf16.mxu1 %v4308_v13  ;;  %v4342_v24 = vld [vmem:[#allocation4 + $0x2c8] ss:$16 sps:$4 sm:$0xff]   ;;  %v4347_v13 = vld [vmem:[#allocation4 + $0xac] ss:$16 sps:$4 sm:$0xff]  }
 0x172   :  { %2745 = vmatpush2.bf16.msra.mxu0 %v4303_v25  ;;  %2786 = vmatpush2.bf16.msra.mxu1 %v4306_v26  ;;  %v4350_v25 = vld [vmem:[#allocation4 + $0x2ac] ss:$16 sps:$4 sm:$0xff]   ;;  %v4345_v26 = vld [vmem:[#allocation4 + $0xa8] ss:$16 sps:$4 sm:$0xff]  }
 0x173   :  { %2746 = vmatprep.subr.bf16.mxu0 %v4311_v27  ;;  %2787 = vmatprep.subr.bf16.mxu1 %v4314_v28  ;;  %v4348_v27 = vld [vmem:[#allocation4 + $0x2a8] ss:$16 sps:$4 sm:$0xff]   ;;  %v4353_v28 = vld [vmem:[#allocation4 + $0x8c] ss:$16 sps:$4 sm:$0xff]  }
 0x176   :  { %2747 = vmatpush2.bf16.msra.mxu0 %v4309_v29  ;;  %2788 = vmatpush2.bf16.msra.mxu1 %v4312_v30  ;;  %v4356_v29 = vld [vmem:[#allocation4 + $0x28c] ss:$16 sps:$4 sm:$0xff]   ;;  %v4351_v30 = vld [vmem:[#allocation4 + $0x88] ss:$16 sps:$4 sm:$0xff]  }
 0x177   :  { %2748 = vmatprep.subr.bf16.mxu0 %v4317_v31  ;;  %2789 = vmatprep.subr.bf16.mxu1 %v4320_v32  ;;  %v4359_v31 = vld [vmem:[#allocation4 + $0x6c] ss:$16 sps:$4 sm:$0xff]  }
 0x178   :  { %v4362_v32 = vld [vmem:[#allocation4 + $0x26c] ss:$16 sps:$4 sm:$0xff]  }
 0x17a   :  { %2749 = vmatpush2.bf16.msra.mxu0 %v4315_v37  ;;  %2790 = vmatpush2.bf16.msra.mxu1 %v4318_v41  ;;  %v4368_v37 = vld [vmem:[#allocation4 + $0x24c] ss:$16 sps:$4 sm:$0xff]   ;;  %v4366_v41 = vld [vmem:[#allocation4 + $0x248] ss:$16 sps:$4 sm:$0xff]  }
 0x17b   :  { %v1018_v48 = vpop.f32.mrf.mxu0  ;;  %2750 = vmatprep.subr.bf16.mxu0 %v4323_v42  ;;  %v1059_v53 = vpop.f32.mrf.mxu1  ;;  %2791 = vmatprep.subr.bf16.mxu1 %v4326_v44  ;;  %v4371_v42 = vld [vmem:[#allocation4 + $0x2c] ss:$16 sps:$4 sm:$0xff]   ;;  %v4372_v44 = vld [vmem:[#allocation4 + $0x228] ss:$16 sps:$4 sm:$0xff]  }
 0x17c   :  { %v1019_v52 = vadd.f32 %v1018_v48, %v241_v43  ;;  %v1060_v55 = vadd.f32 %v1059_v53, %v249_v45  ;;  %v4369_v43 = vld [vmem:[#allocation4 + $0x28] ss:$16 sps:$4 sm:$0xff]   ;;  %v4377_v45 = vld [vmem:[#allocation4 + $0xc] ss:$16 sps:$4 sm:$0xff]  }
 0x17d   :  { %v1020_v56 = vpop.f32.mrf.mxu0  ;;  %v1061_v59 = vpop.f32.mrf.mxu1  ;;  %v4378_v48 = vld [vmem:[#allocation4 + $0x208] ss:$16 sps:$4 sm:$0xff]   ;;  %v4389_v53 = vld [vmem:[#allocation4 + $0x1cc] ss:$16 sps:$4 sm:$0xff]  }
 0x17e   :  { %v1021_v58 = vadd.f32 %v1020_v56, %v245_v47  ;;  %2751 = vmatpush2.bf16.msra.mxu0 %v4321_v46  ;;  %v1070_v61 = vmax.f32 %v1019_v52, 0.0  ;;  %v1072_v62 = vmax.f32 %v1060_v55, 0.0  ;;  %v1062_v63 = vadd.f32 %v1061_v59, %v253_v50  ;;  %2792 = vmatpush2.bf16.msra.mxu1 %v4324_v49  ;;  %v4380_v46 = vld [vmem:[#allocation4 + $0x20c] ss:$16 sps:$4 sm:$0xff]   ;;  %v4375_v47 = vld [vmem:[#allocation4 + $0x8] ss:$16 sps:$4 sm:$0xff]  }
 0x17f   :  { %v1022_v0 = vpop.f32.mrf.mxu0  ;;  %2752 = vmatprep.subr.bf16.mxu0 %v4329_v51  ;;  %v1063_v3 = vpop.f32.mrf.mxu1  ;;  %2793 = vmatprep.subr.bf16.mxu1 %v4332_v54  ;;  %v4383_v49 = vld [vmem:[#allocation4 + $0x1ec] ss:$16 sps:$4 sm:$0xff]   ;;  %v4381_v51 = vld [vmem:[#allocation4 + $0x1e8] ss:$16 sps:$4 sm:$0xff]  }
 0x180   :  { %v1071_v11 = vmax.f32 %v1021_v58, 0.0  ;;  %v1073_v5 = vmax.f32 %v1062_v63, 0.0  ;;  %v4860_v7 = vpack.c.bf16 %v1072_v62, %v1072_v62  ;;  %v4864_v18 = vpack.c.bf16 %v1070_v61, %v1070_v61  ;;  %v4386_v50 = vld [vmem:[#allocation4 + $0x3ec] ss:$16 sps:$4 sm:$0xff]   ;;  %v4384_v52 = vld [vmem:[#allocation4 + $0x3e8] ss:$16 sps:$4 sm:$0xff]  }
 0x181   :  { %v1023_v6 = vpop.f32.mrf.mxu0  ;;  %v1064_v16 = vpop.f32.mrf.mxu1  ;;  %v4392_v54 = vld [vmem:[#allocation4 + $0x3cc] ss:$16 sps:$4 sm:$0xff]   ;;  %v4387_v55 = vld [vmem:[#allocation4 + $0x1c8] ss:$16 sps:$4 sm:$0xff]  }
 0x182   :  { %v4862_v8 = vpack.c.bf16 %v1071_v11, %v1071_v11  ;;  %2753 = vmatpush2.bf16.msra.mxu0 %v4327_v60  ;;  %v4866_v19 = vpack.c.bf16 %v1073_v5, %v1073_v5  ;;  %2794 = vmatpush2.bf16.msra.mxu1 %v4330_v1  ;;  %v4390_v56 = vld [vmem:[#allocation4 + $0x3c8] ss:$16 sps:$4 sm:$0xff]   ;;  %v4395_v58 = vld [vmem:[#allocation4 + $0x1ac] ss:$16 sps:$4 sm:$0xff]  }
 0x183   :  { %2804 = vmatprep.subr.bf16.mxu0 %v4335_v2  ;;  %2845 = vmatprep.subr.bf16.mxu1 %v4338_v4  ;;  %v4398_v59 = vld [vmem:[#allocation4 + $0x3ac] ss:$16 sps:$4 sm:$0xff]   ;;  %v4393_v60 = vld [vmem:[#allocation4 + $0x1a8] ss:$16 sps:$4 sm:$0xff]  }
 0x184   :  { %2754 = vmatprep.mubr.bf16.mxu0 %v4862_v8  ;;  %2795 = vmatprep.mubr.bf16.mxu1 %v4866_v19  ;;  %v4396_v61 = vld [vmem:[#allocation4 + $0x3a8] ss:$16 sps:$4 sm:$0xff]   ;;  %v4401_v62 = vld [vmem:[#allocation4 + $0x18c] ss:$16 sps:$4 sm:$0xff]  }
 0x185   :  { %2755 = vmatmul.mubr.bf16.vlgmr.msra.gmra.mxu0 %v4864_v18  ;;  %2796 = vmatmul.mubr.bf16.vlgmr.msra.gmra.mxu1 %v4860_v7  ;;  %v4404_v63 = vld [vmem:[#allocation4 + $0x38c] ss:$16 sps:$4 sm:$0xff]   ;;  %v4399_v0 = vld [vmem:[#allocation4 + $0x188] ss:$16 sps:$4 sm:$0xff]  }
 0x186   :  { %2805 = vmatpush1.bf16.msra.mxu0 %v4333_v17  ;;  %2846 = vmatpush1.bf16.msra.mxu1 %v4336_v20  ;;  %v4402_v1 = vld [vmem:[#allocation4 + $0x388] ss:$16 sps:$4 sm:$0xff]   ;;  %v4407_v2 = vld [vmem:[#allocation4 + $0x16c] ss:$16 sps:$4 sm:$0xff]  }
 0x187   :  { %2836 = vmatprep.mubr.bf16.mxu0 %v4842_v35  ;;  %2877 = vmatprep.mubr.bf16.mxu1 %v4846_v39  ;;  %v4354_v35 = vld [vmem:[#allocation4 + $0x288] ss:$16 sps:$4 sm:$0xff]   ;;  %v4410_v11 = vld [vmem:[#allocation4 + $0x36c] ss:$16 sps:$4 sm:$0xff]  }
 0x188   :  { %2806 = vmatprep.subr.bf16.mxu0 %v4341_v21  ;;  %2847 = vmatprep.subr.bf16.mxu1 %v4344_v22  ;;  %v4357_v39 = vld [vmem:[#allocation4 + $0x68] ss:$16 sps:$4 sm:$0xff]   ;;  %v4413_v5 = vld [vmem:[#allocation4 + $0x14c] ss:$16 sps:$4 sm:$0xff]  }
 0x189   :  { %v4405_v3 = vld [vmem:[#allocation4 + $0x168] ss:$16 sps:$4 sm:$0xff]   ;;  %v4416_v6 = vld [vmem:[#allocation4 + $0x34c] ss:$16 sps:$4 sm:$0xff]  }
 0x18a   :  { %2807 = vmatpush1.bf16.msra.mxu0 %v4339_v23  ;;  %2848 = vmatpush1.bf16.msra.mxu1 %v4342_v24  ;;  %v4408_v4 = vld [vmem:[#allocation4 + $0x368] ss:$16 sps:$4 sm:$0xff]   ;;  %v4419_v20 = vld [vmem:[#allocation4 + $0x12c] ss:$16 sps:$4 sm:$0xff]  }
 0x18b   :  { %2808 = vmatprep.subr.bf16.mxu0 %v4347_v13  ;;  %2849 = vmatprep.subr.bf16.mxu1 %v4350_v25  ;;  %v4411_v16 = vld [vmem:[#allocation4 + $0x148] ss:$16 sps:$4 sm:$0xff]   ;;  %v4422_v21 = vld [vmem:[#allocation4 + $0x32c] ss:$16 sps:$4 sm:$0xff]  }
 0x18c   :  { %v4414_v17 = vld [vmem:[#allocation4 + $0x348] ss:$16 sps:$4 sm:$0xff]   ;;  %v4425_v24 = vld [vmem:[#allocation4 + $0x10c] ss:$16 sps:$4 sm:$0xff]  }
 0x18d   :  { %v4417_v22 = vld [vmem:[#allocation4 + $0x128] ss:$16 sps:$4 sm:$0xff]   ;;  %v4428_v13 = vld [vmem:[#allocation4 + $0x30c] ss:$16 sps:$4 sm:$0xff]  }
 0x18e   :  { %2809 = vmatpush1.bf16.msra.mxu0 %v4345_v26  ;;  %2850 = vmatpush1.bf16.msra.mxu1 %v4348_v27  ;;  %v4420_v23 = vld [vmem:[#allocation4 + $0x328] ss:$16 sps:$4 sm:$0xff]   ;;  %v4431_v27 = vld [vmem:[#allocation4 + $0x4ec] ss:$16 sps:$4 sm:$0xff]  }
 0x18f   :  { %2810 = vmatprep.subr.bf16.mxu0 %v4353_v28  ;;  %2851 = vmatprep.subr.bf16.mxu1 %v4356_v29  ;;  %v4423_v25 = vld [vmem:[#allocation4 + $0x108] ss:$16 sps:$4 sm:$0xff]   ;;  %v4434_v28 = vld [vmem:[#allocation4 + $0x6ec] ss:$16 sps:$4 sm:$0xff]  }
 0x190   :  { %v4426_v26 = vld [vmem:[#allocation4 + $0x308] ss:$16 sps:$4 sm:$0xff]  }
 0x191   :  { %v4429_v29 = vld [vmem:[#allocation4 + $0x4e8] ss:$16 sps:$4 sm:$0xff]  }
 0x192   :  { %2811 = vmatpush1.bf16.msra.mxu0 %v4351_v30  ;;  %2852 = vmatpush1.bf16.msra.mxu1 %v4354_v35  ;;  %v4432_v30 = vld [vmem:[#allocation4 + $0x6e8] ss:$16 sps:$4 sm:$0xff]   ;;  %v4437_v35 = vld [vmem:[#allocation4 + $0x4cc] ss:$16 sps:$4 sm:$0xff]  }
 0x193   :  { %2812 = vmatprep.subr.bf16.mxu0 %v4359_v31  ;;  %2853 = vmatprep.subr.bf16.mxu1 %v4362_v32  ;;  %v4440_v31 = vld [vmem:[#allocation4 + $0x6cc] ss:$16 sps:$4 sm:$0xff]   ;;  %v4435_v32 = vld [vmem:[#allocation4 + $0x4c8] ss:$16 sps:$4 sm:$0xff]  }
 0x196   :  { %2813 = vmatpush1.bf16.msra.mxu0 %v4357_v39  ;;  %2854 = vmatpush1.bf16.msra.mxu1 %v4360_v33  ;;  %v4438_v39 = vld [vmem:[#allocation4 + $0x6c8] ss:$16 sps:$4 sm:$0xff]   ;;  %v4443_v33 = vld [vmem:[#allocation4 + $0x4ac] ss:$16 sps:$4 sm:$0xff]  }
 0x197   :  { %2814 = vmatprep.subr.bf16.mxu0 %v4365_v36  ;;  %2855 = vmatprep.subr.bf16.mxu1 %v4368_v37  ;;  %v4446_v36 = vld [vmem:[#allocation4 + $0x6ac] ss:$16 sps:$4 sm:$0xff]   ;;  %v4441_v37 = vld [vmem:[#allocation4 + $0x4a8] ss:$16 sps:$4 sm:$0xff]  }
 0x19a   :  { %2815 = vmatpush1.bf16.msra.mxu0 %v4363_v40  ;;  %2856 = vmatpush1.bf16.msra.mxu1 %v4366_v41  ;;  %v4449_v40 = vld [vmem:[#allocation4 + $0x48c] ss:$16 sps:$4 sm:$0xff]   ;;  %v4447_v41 = vld [vmem:[#allocation4 + $0x488] ss:$16 sps:$4 sm:$0xff]  }
 0x19b   :  { %2816 = vmatprep.subr.bf16.mxu0 %v4371_v42  ;;  %2857 = vmatprep.subr.bf16.mxu1 %v4374_v57  ;;  %v4455_v42 = vld [vmem:[#allocation4 + $0x46c] ss:$16 sps:$4 sm:$0xff]  }
 0x19c   :  { %v4458_v57 = vld [vmem:[#allocation4 + $0x66c] ss:$16 sps:$4 sm:$0xff]  }
 0x19e   :  { %2817 = vmatpush1.bf16.msra.mxu0 %v4369_v43  ;;  %2858 = vmatpush1.bf16.msra.mxu1 %v4372_v44  ;;  %v4456_v43 = vld [vmem:[#allocation4 + $0x668] ss:$16 sps:$4 sm:$0xff]   ;;  %v4461_v44 = vld [vmem:[#allocation4 + $0x44c] ss:$16 sps:$4 sm:$0xff]  }
 0x19f   :  { %2818 = vmatprep.subr.bf16.mxu0 %v4377_v45  ;;  %2859 = vmatprep.subr.bf16.mxu1 %v4380_v46  ;;  %v4464_v45 = vld [vmem:[#allocation4 + $0x64c] ss:$16 sps:$4 sm:$0xff]   ;;  %v4459_v46 = vld [vmem:[#allocation4 + $0x448] ss:$16 sps:$4 sm:$0xff]  }
 0x1a2   :  { %2819 = vmatpush1.bf16.msra.mxu0 %v4375_v47  ;;  %2860 = vmatpush1.bf16.msra.mxu1 %v4378_v48  ;;  %v4462_v47 = vld [vmem:[#allocation4 + $0x648] ss:$16 sps:$4 sm:$0xff]   ;;  %v4467_v48 = vld [vmem:[#allocation4 + $0x42c] ss:$16 sps:$4 sm:$0xff]  }
 0x1a3   :  { %2820 = vmatprep.subr.bf16.mxu0 %v4383_v49  ;;  %2861 = vmatprep.subr.bf16.mxu1 %v4386_v50  ;;  %v4470_v49 = vld [vmem:[#allocation4 + $0x62c] ss:$16 sps:$4 sm:$0xff]   ;;  %v4465_v50 = vld [vmem:[#allocation4 + $0x428] ss:$16 sps:$4 sm:$0xff]  }
 0x1a6   :  { %2821 = vmatpush2.bf16.msra.mxu0 %v4381_v51  ;;  %2862 = vmatpush2.bf16.msra.mxu1 %v4384_v52  ;;  %v4468_v51 = vld [vmem:[#allocation4 + $0x628] ss:$16 sps:$4 sm:$0xff]   ;;  %v4473_v52 = vld [vmem:[#allocation4 + $0x40c] ss:$16 sps:$4 sm:$0xff]  }
 0x1a7   :  { %2822 = vmatprep.subr.bf16.mxu0 %v4389_v53  ;;  %2863 = vmatprep.subr.bf16.mxu1 %v4392_v54  ;;  %v4476_v53 = vld [vmem:[#allocation4 + $0x60c] ss:$16 sps:$4 sm:$0xff]   ;;  %v4471_v54 = vld [vmem:[#allocation4 + $0x408] ss:$16 sps:$4 sm:$0xff]  }
 0x1aa   :  { %2823 = vmatpush2.bf16.msra.mxu0 %v4387_v55  ;;  %2864 = vmatpush2.bf16.msra.mxu1 %v4390_v56  ;;  %v4474_v55 = vld [vmem:[#allocation4 + $0x608] ss:$16 sps:$4 sm:$0xff]   ;;  %v4479_v56 = vld [vmem:[#allocation4 + $0x5ec] ss:$16 sps:$4 sm:$0xff]  }
 0x1ab   :  { %2824 = vmatprep.subr.bf16.mxu0 %v4395_v58  ;;  %2865 = vmatprep.subr.bf16.mxu1 %v4398_v59  ;;  %v4482_v58 = vld [vmem:[#allocation4 + $0x7ec] ss:$16 sps:$4 sm:$0xff]   ;;  %v4477_v59 = vld [vmem:[#allocation4 + $0x5e8] ss:$16 sps:$4 sm:$0xff]  }
 0x1ae   :  { %2825 = vmatpush2.bf16.msra.mxu0 %v4393_v60  ;;  %2866 = vmatpush2.bf16.msra.mxu1 %v4396_v61  ;;  %v4480_v60 = vld [vmem:[#allocation4 + $0x7e8] ss:$16 sps:$4 sm:$0xff]   ;;  %v4485_v61 = vld [vmem:[#allocation4 + $0x5cc] ss:$16 sps:$4 sm:$0xff]  }
 0x1af   :  { %2826 = vmatprep.subr.bf16.mxu0 %v4401_v62  ;;  %2867 = vmatprep.subr.bf16.mxu1 %v4404_v63  ;;  %v4488_v62 = vld [vmem:[#allocation4 + $0x7cc] ss:$16 sps:$4 sm:$0xff]   ;;  %v4483_v63 = vld [vmem:[#allocation4 + $0x5c8] ss:$16 sps:$4 sm:$0xff]  }
 0x1b2   :  { %2827 = vmatpush2.bf16.msra.mxu0 %v4399_v0  ;;  %2868 = vmatpush2.bf16.msra.mxu1 %v4402_v1  ;;  %v4486_v0 = vld [vmem:[#allocation4 + $0x7c8] ss:$16 sps:$4 sm:$0xff]   ;;  %v4491_v1 = vld [vmem:[#allocation4 + $0x5ac] ss:$16 sps:$4 sm:$0xff]  }
 0x1b3   :  { %2828 = vmatprep.subr.bf16.mxu0 %v4407_v2  ;;  %2869 = vmatprep.subr.bf16.mxu1 %v4410_v11  ;;  %v4494_v2 = vld [vmem:[#allocation4 + $0x7ac] ss:$16 sps:$4 sm:$0xff]   ;;  %v4489_v11 = vld [vmem:[#allocation4 + $0x5a8] ss:$16 sps:$4 sm:$0xff]  }
 0x1b6   :  { %2829 = vmatpush2.bf16.msra.mxu0 %v4405_v3  ;;  %2870 = vmatpush2.bf16.msra.mxu1 %v4408_v4  ;;  %v4492_v3 = vld [vmem:[#allocation4 + $0x7a8] ss:$16 sps:$4 sm:$0xff]   ;;  %v4497_v4 = vld [vmem:[#allocation4 + $0x58c] ss:$16 sps:$4 sm:$0xff]  }
 0x1b7   :  { %2830 = vmatprep.subr.bf16.mxu0 %v4413_v5  ;;  %2871 = vmatprep.subr.bf16.mxu1 %v4416_v6  ;;  %v4500_v5 = vld [vmem:[#allocation4 + $0x78c] ss:$16 sps:$4 sm:$0xff]   ;;  %v4495_v6 = vld [vmem:[#allocation4 + $0x588] ss:$16 sps:$4 sm:$0xff]  }
 0x1ba   :  { %2831 = vmatpush2.bf16.msra.mxu0 %v4411_v16  ;;  %2872 = vmatpush2.bf16.msra.mxu1 %v4414_v17  ;;  %v4498_v16 = vld [vmem:[#allocation4 + $0x788] ss:$16 sps:$4 sm:$0xff]   ;;  %v4503_v17 = vld [vmem:[#allocation4 + $0x56c] ss:$16 sps:$4 sm:$0xff]  }
 0x1bb   :  { %2832 = vmatprep.subr.bf16.mxu0 %v4419_v20  ;;  %2873 = vmatprep.subr.bf16.mxu1 %v4422_v21  ;;  %v4506_v20 = vld [vmem:[#allocation4 + $0x76c] ss:$16 sps:$4 sm:$0xff]   ;;  %v4501_v21 = vld [vmem:[#allocation4 + $0x568] ss:$16 sps:$4 sm:$0xff]  }
 0x1be   :  { %2833 = vmatpush2.bf16.msra.mxu0 %v4417_v22  ;;  %2874 = vmatpush2.bf16.msra.mxu1 %v4420_v23  ;;  %v4504_v22 = vld [vmem:[#allocation4 + $0x768] ss:$16 sps:$4 sm:$0xff]   ;;  %v4509_v23 = vld [vmem:[#allocation4 + $0x54c] ss:$16 sps:$4 sm:$0xff]  }
 0x1bf   :  { %2834 = vmatprep.subr.bf16.mxu0 %v4425_v24  ;;  %2875 = vmatprep.subr.bf16.mxu1 %v4428_v13  ;;  %v4512_v24 = vld [vmem:[#allocation4 + $0x74c] ss:$16 sps:$4 sm:$0xff]   ;;  %v4507_v13 = vld [vmem:[#allocation4 + $0x548] ss:$16 sps:$4 sm:$0xff]  }
 0x1c2   :  { %2835 = vmatpush2.bf16.msra.mxu0 %v4423_v25  ;;  %2876 = vmatpush2.bf16.msra.mxu1 %v4426_v26  ;;  %v4510_v25 = vld [vmem:[#allocation4 + $0x748] ss:$16 sps:$4 sm:$0xff]   ;;  %v4515_v26 = vld [vmem:[#allocation4 + $0x52c] ss:$16 sps:$4 sm:$0xff]  }
 0x1c3   :  { %2886 = vmatprep.subr.bf16.mxu0 %v4431_v27  ;;  %2927 = vmatprep.subr.bf16.mxu1 %v4434_v28  ;;  %v4518_v27 = vld [vmem:[#allocation4 + $0x72c] ss:$16 sps:$4 sm:$0xff]   ;;  %v4513_v28 = vld [vmem:[#allocation4 + $0x528] ss:$16 sps:$4 sm:$0xff]  }
 0x1c5   :  { %2837 = vmatmul.mubr.bf16.vlgmr.msra.gmra.mxu0 %v4844_v38  ;;  %2878 = vmatmul.mubr.bf16.vlgmr.msra.gmra.mxu1 %v4840_v34  ;;  %v4444_v38 = vld [vmem:[#allocation4 + $0x6a8] ss:$16 sps:$4 sm:$0xff]   ;;  %v4452_v34 = vld [vmem:[#allocation4 + $0x68c] ss:$16 sps:$4 sm:$0xff]  }
 0x1c6   :  { %2887 = vmatpush1.bf16.msra.mxu0 %v4429_v29  ;;  %2918 = vmatprep.mubr.bf16.mxu0 %v4862_v8  ;;  %v4450_v8 = vld [vmem:[#allocation4 + $0x688] ss:$16 sps:$4 sm:$0xff]  }
 0x1c7   :  { %2928 = vmatpush1.bf16.msra.mxu1 %v4432_v30  ;;  %2959 = vmatprep.mubr.bf16.mxu1 %v4866_v19  ;;  %v4453_v19 = vld [vmem:[#allocation4 + $0x468] ss:$16 sps:$4 sm:$0xff]   ;;  %v4521_v30 = vld [vmem:[#allocation4 + $0x50c] ss:$16 sps:$4 sm:$0xff]  }
 0x1c8   :  { %2888 = vmatprep.subr.bf16.mxu0 %v4437_v35  ;;  %2929 = vmatprep.subr.bf16.mxu1 %v4440_v31  ;;  %v4516_v29 = vld [vmem:[#allocation4 + $0x728] ss:$16 sps:$4 sm:$0xff]   ;;  %v4524_v35 = vld [vmem:[#allocation4 + $0x70c] ss:$16 sps:$4 sm:$0xff]  }
 0x1c9   :  { %v4519_v31 = vld [vmem:[#allocation4 + $0x508] ss:$16 sps:$4 sm:$0xff]  }
 0x1ca   :  { %2889 = vmatpush1.bf16.msra.mxu0 %v4435_v32  ;;  %v4522_v32 = vld [vmem:[#allocation4 + $0x708] ss:$16 sps:$4 sm:$0xff]  }
 0x1cb   :  { %2930 = vmatpush1.bf16.msra.mxu1 %v4438_v39  ;;  %2890 = vmatprep.subr.bf16.mxu0 %v4443_v33  ;;  %v4527_v39 = vld [vmem:[#allocation6 + $0x74] ss:$8 sps:$4 sm:$0xff]   ;;  %v4525_v33 = vld [vmem:[#allocation6 + $0x70] ss:$8 sps:$4 sm:$0xff]  }
 0x1cc   :  { %2931 = vmatprep.subr.bf16.mxu1 %v4446_v36  ;;  %v4530_v36 = vld [vmem:[#allocation6 + $0x64] ss:$8 sps:$4 sm:$0xff]  }
 0x1ce   :  { %2891 = vmatpush1.bf16.msra.mxu0 %v4441_v37 }
 0x1cf   :  { %2932 = vmatpush1.bf16.msra.mxu1 %v4444_v38  ;;  %2892 = vmatprep.subr.bf16.mxu0 %v4449_v40  ;;  %v4528_v40 = vld [vmem:[#allocation6 + $0x60] ss:$8 sps:$4 sm:$0xff]  }
 0x1d0   :  { %2933 = vmatprep.subr.bf16.mxu1 %v4452_v34 }
 0x1d2   :  { %2893 = vmatpush1.bf16.msra.mxu0 %v4447_v41  ;;  %v4533_v41 = vld [vmem:[#allocation6 + $0x54] ss:$8 sps:$4 sm:$0xff]  }
 0x1d3   :  { %2934 = vmatpush1.bf16.msra.mxu1 %v4450_v8  ;;  %2894 = vmatprep.subr.bf16.mxu0 %v4455_v42 }
 0x1d4   :  { %2935 = vmatprep.subr.bf16.mxu1 %v4458_v57 }
 0x1d6   :  { %2895 = vmatpush1.bf16.msra.mxu0 %v4453_v19  ;;  %v4531_v19 = vld [vmem:[#allocation6 + $0x50] ss:$8 sps:$4 sm:$0xff]  }
 0x1d7   :  { %2936 = vmatpush1.bf16.msra.mxu1 %v4456_v43  ;;  %2896 = vmatprep.subr.bf16.mxu0 %v4461_v44 }
 0x1d8   :  { %2937 = vmatprep.subr.bf16.mxu1 %v4464_v45  ;;  %v4573_v45 = vld [vmem:[#allocation6 + $0x170] ss:$8 sps:$4 sm:$0xff]  }
 0x1da   :  { %2897 = vmatpush1.bf16.msra.mxu0 %v4459_v46  ;;  %v4578_v46 = vld [vmem:[#allocation6 + $0x164] ss:$8 sps:$4 sm:$0xff]  }
 0x1db   :  { %2938 = vmatpush1.bf16.msra.mxu1 %v4462_v47  ;;  %2898 = vmatprep.subr.bf16.mxu0 %v4467_v48  ;;  %v4534_v47 = vld [vmem:[#allocation6 + $0x40] ss:$8 sps:$4 sm:$0xff]   ;;  %v4539_v48 = vld [vmem:[#allocation6 + $0x34] ss:$8 sps:$4 sm:$0xff]  }
 0x1dc   :  { %2939 = vmatprep.subr.bf16.mxu1 %v4470_v49  ;;  %v4576_v49 = vld [vmem:[#allocation6 + $0x160] ss:$8 sps:$4 sm:$0xff]  }
 0x1de   :  { %2899 = vmatpush1.bf16.msra.mxu0 %v4465_v50  ;;  %v4581_v50 = vld [vmem:[#allocation6 + $0x154] ss:$8 sps:$4 sm:$0xff]  }
 0x1df   :  { %2940 = vmatpush1.bf16.msra.mxu1 %v4468_v51  ;;  %2900 = vmatprep.subr.bf16.mxu0 %v4473_v52  ;;  %v4537_v51 = vld [vmem:[#allocation6 + $0x30] ss:$8 sps:$4 sm:$0xff]   ;;  %v4542_v52 = vld [vmem:[#allocation6 + $0x24] ss:$8 sps:$4 sm:$0xff]  }
 0x1e0   :  { %2941 = vmatprep.subr.bf16.mxu1 %v4476_v53  ;;  %v4579_v53 = vld [vmem:[#allocation6 + $0x150] ss:$8 sps:$4 sm:$0xff]  }
 0x1e2   :  { %2901 = vmatpush1.bf16.msra.mxu0 %v4471_v54  ;;  %v4584_v54 = vld [vmem:[#allocation6 + $0x144] ss:$8 sps:$4 sm:$0xff]  }
 0x1e3   :  { %2942 = vmatpush1.bf16.msra.mxu1 %v4474_v55  ;;  %2902 = vmatprep.subr.bf16.mxu0 %v4479_v56  ;;  %v4540_v55 = vld [vmem:[#allocation6 + $0x20] ss:$8 sps:$4 sm:$0xff]   ;;  %v4545_v56 = vld [vmem:[#allocation6 + $0x14] ss:$8 sps:$4 sm:$0xff]  }
 0x1e4   :  { %2943 = vmatprep.subr.bf16.mxu1 %v4482_v58  ;;  %v4582_v58 = vld [vmem:[#allocation6 + $0x140] ss:$8 sps:$4 sm:$0xff]  }
 0x1e6   :  { %2903 = vmatpush2.bf16.msra.mxu0 %v4477_v59  ;;  %v4587_v59 = vld [vmem:[#allocation6 + $0x134] ss:$8 sps:$4 sm:$0xff]  }
 0x1e7   :  { %2944 = vmatpush2.bf16.msra.mxu1 %v4480_v60  ;;  %2904 = vmatprep.subr.bf16.mxu0 %v4485_v61  ;;  %v4543_v60 = vld [vmem:[#allocation6 + $0x10] ss:$8 sps:$4 sm:$0xff]   ;;  %v4548_v61 = vld [vmem:[#allocation6 + $0x4] ss:$8 sps:$4 sm:$0xff]  }
 0x1e8   :  { %2945 = vmatprep.subr.bf16.mxu1 %v4488_v62  ;;  %v4585_v62 = vld [vmem:[#allocation6 + $0x130] ss:$8 sps:$4 sm:$0xff]  }
 0x1ea   :  { %2905 = vmatpush2.bf16.msra.mxu0 %v4483_v63  ;;  %v4590_v63 = vld [vmem:[#allocation6 + $0x124] ss:$8 sps:$4 sm:$0xff]  }
 0x1eb   :  { %2946 = vmatpush2.bf16.msra.mxu1 %v4486_v0  ;;  %2906 = vmatprep.subr.bf16.mxu0 %v4491_v1  ;;  %v4546_v0 = vld [vmem:[#allocation6] ss:$8 sps:$4 sm:$0xff]   ;;  %v4551_v1 = vld [vmem:[#allocation6 + $0xf4] ss:$8 sps:$4 sm:$0xff]  }
 0x1ec   :  { %2947 = vmatprep.subr.bf16.mxu1 %v4494_v2  ;;  %v4588_v2 = vld [vmem:[#allocation6 + $0x120] ss:$8 sps:$4 sm:$0xff]  }
 0x1ee   :  { %2907 = vmatpush2.bf16.msra.mxu0 %v4489_v11  ;;  %v4593_v11 = vld [vmem:[#allocation6 + $0x114] ss:$8 sps:$4 sm:$0xff]  }
 0x1ef   :  { %2948 = vmatpush2.bf16.msra.mxu1 %v4492_v3  ;;  %2908 = vmatprep.subr.bf16.mxu0 %v4497_v4  ;;  %v4549_v3 = vld [vmem:[#allocation6 + $0xf0] ss:$8 sps:$4 sm:$0xff]   ;;  %v4554_v4 = vld [vmem:[#allocation6 + $0xe4] ss:$8 sps:$4 sm:$0xff]  }
 0x1f0   :  { %2949 = vmatprep.subr.bf16.mxu1 %v4500_v5  ;;  %v4591_v5 = vld [vmem:[#allocation6 + $0x110] ss:$8 sps:$4 sm:$0xff]  }
 0x1f2   :  { %2909 = vmatpush2.bf16.msra.mxu0 %v4495_v6  ;;  %v4596_v6 = vld [vmem:[#allocation6 + $0x104] ss:$8 sps:$4 sm:$0xff]  }
 0x1f3   :  { %2950 = vmatpush2.bf16.msra.mxu1 %v4498_v16  ;;  %2910 = vmatprep.subr.bf16.mxu0 %v4503_v17  ;;  %v4552_v16 = vld [vmem:[#allocation6 + $0xe0] ss:$8 sps:$4 sm:$0xff]   ;;  %v4557_v17 = vld [vmem:[#allocation6 + $0xd4] ss:$8 sps:$4 sm:$0xff]  }
 0x1f4   :  { %2951 = vmatprep.subr.bf16.mxu1 %v4506_v20  ;;  %v4594_v20 = vld [vmem:[#allocation6 + $0x100] ss:$8 sps:$4 sm:$0xff]  }
 0x1f6   :  { %2911 = vmatpush2.bf16.msra.mxu0 %v4501_v21  ;;  %v4599_v21 = vld [vmem:[#allocation6 + $0x1f4] ss:$8 sps:$4 sm:$0xff]  }
 0x1f7   :  { %2952 = vmatpush2.bf16.msra.mxu1 %v4504_v22  ;;  %2912 = vmatprep.subr.bf16.mxu0 %v4509_v23  ;;  %v4555_v22 = vld [vmem:[#allocation6 + $0xd0] ss:$8 sps:$4 sm:$0xff]   ;;  %v4560_v23 = vld [vmem:[#allocation6 + $0xc4] ss:$8 sps:$4 sm:$0xff]  }
 0x1f8   :  { %2953 = vmatprep.subr.bf16.mxu1 %v4512_v24  ;;  %v4597_v24 = vld [vmem:[#allocation6 + $0x1f0] ss:$8 sps:$4 sm:$0xff]  }
 0x1fa   :  { %2913 = vmatpush2.bf16.msra.mxu0 %v4507_v13  ;;  %v4602_v13 = vld [vmem:[#allocation6 + $0x1e4] ss:$8 sps:$4 sm:$0xff]  }
 0x1fb   :  { %2954 = vmatpush2.bf16.msra.mxu1 %v4510_v25  ;;  %2914 = vmatprep.subr.bf16.mxu0 %v4515_v26  ;;  %v4558_v25 = vld [vmem:[#allocation6 + $0xc0] ss:$8 sps:$4 sm:$0xff]   ;;  %v4563_v26 = vld [vmem:[#allocation6 + $0xb4] ss:$8 sps:$4 sm:$0xff]  }
 0x1fc   :  { %2955 = vmatprep.subr.bf16.mxu1 %v4518_v27  ;;  %v4600_v27 = vld [vmem:[#allocation6 + $0x1e0] ss:$8 sps:$4 sm:$0xff]  }
 0x1fe   :  { %2915 = vmatpush2.bf16.msra.mxu0 %v4513_v28  ;;  %v4605_v28 = vld [vmem:[#allocation6 + $0x1d4] ss:$8 sps:$4 sm:$0xff]  }
 0x1ff   :  { %2956 = vmatpush2.bf16.msra.mxu1 %v4516_v29  ;;  %2916 = vmatprep.subr.bf16.mxu0 %v4521_v30  ;;  %v4561_v29 = vld [vmem:[#allocation6 + $0xb0] ss:$8 sps:$4 sm:$0xff]   ;;  %v4566_v30 = vld [vmem:[#allocation6 + $0xa4] ss:$8 sps:$4 sm:$0xff]  }
 0x200   :  { %2957 = vmatprep.subr.bf16.mxu1 %v4524_v35  ;;  %v4603_v35 = vld [vmem:[#allocation6 + $0x1d0] ss:$8 sps:$4 sm:$0xff]  }
 0x202   :  { %2917 = vmatpush2.bf16.msra.mxu0 %v4519_v31  ;;  %v4608_v31 = vld [vmem:[#allocation6 + $0x1c4] ss:$8 sps:$4 sm:$0xff]  }
 0x203   :  { %2958 = vmatpush2.bf16.msra.mxu1 %v4522_v32  ;;  %3372 = vmatprep.subr.bf16.mxu0 %v4527_v39  ;;  %v4564_v32 = vld [vmem:[#allocation6 + $0xa0] ss:$8 sps:$4 sm:$0xff]   ;;  %v4569_v39 = vld [vmem:[#allocation6 + $0x94] ss:$8 sps:$4 sm:$0xff]  }
 0x205   :  { %2919 = vmatmul.mubr.bf16.vlgmr.msra.gmra.mxu0 %v4864_v18  ;;  %v4879_v37 = vpop.f32.mrf.mxu0  ;;  %v4882_v38 = vpop.f32.mrf.mxu1  ;;  %v4536_v18 = vld [vmem:[#allocation6 + $0x44] ss:$8 sps:$4 sm:$0xff]  }
 0x206   :  { %2960 = vmatmul.mubr.bf16.vlgmr.msra.gmra.mxu1 %v4860_v7  ;;  %3373 = vmatpush1.bf16.msra.mxu0 %v4525_v33  ;;  %v4575_v7 = vld [vmem:[#allocation6 + $0x174] ss:$8 sps:$4 sm:$0xff]   ;;  %v4606_v33 = vld [vmem:[#allocation6 + $0x1c0] ss:$8 sps:$4 sm:$0xff]  }
 0x207   :  { %v4884_v34 = vpop.f32.mrf.mxu0  ;;  %3374 = vmatprep.subr.bf16.mxu0 %v4530_v36  ;;  %v4886_v8 = vpop.f32.mrf.mxu1  ;;  %3413 = vmatprep.subr.bf16.mxu1 %v4575_v7  ;;  %v4611_v36 = vld [vmem:[#allocation6 + $0x1b4] ss:$8 sps:$4 sm:$0xff]  }
 0x208   :  { %3414 = vmatpush1.bf16.msra.mxu1 %v4573_v45 }
 0x209   :  { %v2678_v42 = vpop.f32.mrf.mxu0  ;;  %v2719_v57 = vpop.f32.mrf.mxu1  ;;  %3415 = vmatprep.subr.bf16.mxu1 %v4578_v46 }
 0x20a   :  { %3375 = vmatpush1.bf16.msra.mxu0 %v4528_v40  ;;  %v4891_v40 = vld [vmem:[%s4922_s4] sm:$0xf]  ;;  %v4572_v42 = vld [vmem:[#allocation6 + $0x84] ss:$8 sps:$4 sm:$0xff]   ;;  %v4609_v57 = vld [vmem:[#allocation6 + $0x1b0] ss:$8 sps:$4 sm:$0xff]  }
 0x20b   :  { %v2679_v43 = vpop.f32.mrf.mxu0  ;;  %3376 = vmatprep.subr.bf16.mxu0 %v4533_v41  ;;  %v2720_v44 = vpop.f32.mrf.mxu1  ;;  %v4567_v41 = vld [vmem:[#allocation6 + $0x90] ss:$8 sps:$4 sm:$0xff]  }
 0x20c   :  { %3416 = vmatpush1.bf16.msra.mxu1 %v4576_v49  ;;  %v1347_v43 = vrot.slane %v4891_v40, %v4827_v14 }
 0x20d   :  { %3417 = vmatprep.subr.bf16.mxu1 %v4581_v50 }
 0x20e   :  { %3377 = vmatpush1.bf16.msra.mxu0 %v4531_v19  ;;  %v1343_v19 = vrot.slane %v4891_v40, %v4818_v10  ;;  %v2677_v45 = vadd.f32 %v4884_v34, %v1347_v43 }
 0x20f   :  { %3378 = vmatprep.subr.bf16.mxu0 %v4536_v18  ;;  %v4570_v18 = vld [vmem:[#allocation6 + $0x80] ss:$8 sps:$4 sm:$0xff]  }
 0x210   :  { %3418 = vmatpush1.bf16.msra.mxu1 %v4579_v53  ;;  %v2675_v44 = vadd.f32 %v4879_v37, %v1343_v19  ;;  %v4617_v37 = vld [vmem:[#allocation6 + $0x194] ss:$8 sps:$4 sm:$0xff]  }
 0x211   :  { %3419 = vmatprep.subr.bf16.mxu1 %v4584_v54 }
 0x212   :  { %3379 = vmatpush1.bf16.msra.mxu0 %v4534_v47  ;;  %v2716_v7 = vadd.f32 %v4882_v38, %v2675_v44  ;;  %v4614_v47 = vld [vmem:[#allocation6 + $0x1a4] ss:$8 sps:$4 sm:$0xff]  }
 0x213   :  { %3380 = vmatprep.subr.bf16.mxu0 %v4539_v48  ;;  %v2718_v48 = vadd.f32 %v4886_v8, %v2677_v45  ;;  %v4620_v8 = vld [vmem:[#allocation6 + $0x184] ss:$8 sps:$4 sm:$0xff]  }
 0x214   :  { %3420 = vmatpush1.bf16.msra.mxu1 %v4582_v58 }
 0x215   :  { %3421 = vmatprep.subr.bf16.mxu1 %v4587_v59  ;;  %v4615_v59 = vld [vmem:[#allocation6 + $0x190] ss:$8 sps:$4 sm:$0xff]  }
 0x216   :  { %3381 = vmatpush1.bf16.msra.mxu0 %v4537_v51  ;;  %v4612_v51 = vld [vmem:[#allocation6 + $0x1a0] ss:$8 sps:$4 sm:$0xff]  }
 0x217   :  { %3382 = vmatprep.subr.bf16.mxu0 %v4542_v52 }
 0x218   :  { %3422 = vmatpush1.bf16.msra.mxu1 %v4585_v62 }
 0x219   :  { %3423 = vmatprep.subr.bf16.mxu1 %v4590_v63 }
 0x21a   :  { %3383 = vmatpush1.bf16.msra.mxu0 %v4540_v55 }
 0x21b   :  { %3384 = vmatprep.subr.bf16.mxu0 %v4545_v56 }
 0x21c   :  { %3424 = vmatpush1.bf16.msra.mxu1 %v4588_v2 }
 0x21d   :  { %3425 = vmatprep.subr.bf16.mxu1 %v4593_v11 }
 0x21e   :  { %3385 = vmatpush1.bf16.msra.mxu0 %v4543_v60 }
 0x21f   :  { %3386 = vmatprep.subr.bf16.mxu0 %v4548_v61 }
 0x220   :  { %3426 = vmatpush1.bf16.msra.mxu1 %v4591_v5 }
 0x221   :  { %3427 = vmatprep.subr.bf16.mxu1 %v4596_v6 }
 0x222   :  { %3387 = vmatpush1.bf16.msra.mxu0 %v4546_v0  ;;  %v4618_v0 = vld [vmem:[#allocation6 + $0x180] ss:$8 sps:$4 sm:$0xff]  }
 0x223   :  { %3388 = vmatprep.subr.bf16.mxu0 %v4551_v1 }
 0x224   :  { %3428 = vmatpush1.bf16.msra.mxu1 %v4594_v20  ;;  %v4621_v20 = vld [vmem:[#allocation7 + $0x78] sm:$0xff]  }
 0x225   :  { %3429 = vmatprep.subr.bf16.mxu1 %v4599_v21  ;;  %v4622_v21 = vld [vmem:[#allocation7 + $0x38] sm:$0xff]  }
 0x226   :  { %3389 = vmatpush2.bf16.msra.mxu0 %v4549_v3 }
 0x227   :  { %3390 = vmatprep.subr.bf16.mxu0 %v4554_v4 }
 0x228   :  { %3430 = vmatpush2.bf16.msra.mxu1 %v4597_v24  ;;  %v4625_v24 = vld [vmem:[#allocation7 + $0x68] sm:$0xff]  }
 0x229   :  { %3431 = vmatprep.subr.bf16.mxu1 %v4602_v13  ;;  %v4626_v13 = vld [vmem:[#allocation7 + $0x28] sm:$0xff]  }
 0x22a   :  { %3391 = vmatpush2.bf16.msra.mxu0 %v4552_v16 }
 0x22b   :  { %3392 = vmatprep.subr.bf16.mxu0 %v4557_v17 }
 0x22c   :  { %3432 = vmatpush2.bf16.msra.mxu1 %v4600_v27  ;;  %v4629_v27 = vld [vmem:[#allocation7 + $0x58] sm:$0xff]  }
 0x22d   :  { %3433 = vmatprep.subr.bf16.mxu1 %v4605_v28  ;;  %v4630_v28 = vld [vmem:[#allocation7 + $0x18] sm:$0xff]  }
 0x22e   :  { %3393 = vmatpush2.bf16.msra.mxu0 %v4555_v22  ;;  %v4623_v22 = vld [vmem:[#allocation7 + $0x70] sm:$0xff]  }
 0x22f   :  { %3394 = vmatprep.subr.bf16.mxu0 %v4560_v23  ;;  %v4624_v23 = vld [vmem:[#allocation7 + $0x30] sm:$0xff]  }
 0x230   :  { %3434 = vmatpush2.bf16.msra.mxu1 %v4603_v35  ;;  %v1351_v35 = vrot.slane %v4891_v40, %v232_v12 }
 0x231   :  { %3435 = vmatprep.subr.bf16.mxu1 %v4608_v31  ;;  %v1355_v31 = vrot.slane %v4891_v40, %v236_v15 }
 0x232   :  { %3395 = vmatpush2.bf16.msra.mxu0 %v4558_v25  ;;  %v4627_v25 = vld [vmem:[#allocation7 + $0x60] sm:$0xff]  }
 0x233   :  { %3396 = vmatprep.subr.bf16.mxu0 %v4563_v26  ;;  %v4628_v26 = vld [vmem:[#allocation7 + $0x20] sm:$0xff]  }
 0x234   :  { %3436 = vmatpush2.bf16.msra.mxu1 %v4606_v33 }
 0x235   :  { %3437 = vmatprep.subr.bf16.mxu1 %v4611_v36 }
 0x236   :  { %3397 = vmatpush2.bf16.msra.mxu0 %v4561_v29  ;;  %v4631_v29 = vld [vmem:[#allocation7 + $0x50] sm:$0xff]  }
 0x237   :  { %3398 = vmatprep.subr.bf16.mxu0 %v4566_v30  ;;  %v4632_v30 = vld [vmem:[#allocation7 + $0x10] sm:$0xff]  }
 0x238   :  { %3438 = vmatpush2.bf16.msra.mxu1 %v4609_v57 }
 0x239   :  { %3439 = vmatprep.subr.bf16.mxu1 %v4614_v47 }
 0x23a   :  { %3399 = vmatpush2.bf16.msra.mxu0 %v4564_v32 }
 0x23b   :  { %3400 = vmatprep.subr.bf16.mxu0 %v4569_v39 }
 0x23c   :  { %3440 = vmatpush2.bf16.msra.mxu1 %v4612_v51  ;;  %v4633_v51 = vld [vmem:[#allocation7 + $0x48] sm:$0xff]  }
 0x23d   :  { %3441 = vmatprep.subr.bf16.mxu1 %v4617_v37  ;;  %v3040_v37 = vld [vmem:[%s4924_s6] sm:$0x3] }
 0x23e   :  { %3401 = vmatpush2.bf16.msra.mxu0 %v4567_v41 }
 0x23f   :  { %3402 = vmatprep.subr.bf16.mxu0 %v4572_v42 }
 0x240   :  { %3442 = vmatpush2.bf16.msra.mxu1 %v4615_v59 }
 0x241   :  { %3443 = vmatprep.subr.bf16.mxu1 %v4620_v8 }
 0x242   :  { %3403 = vmatpush2.bf16.msra.mxu0 %v4570_v18 }
 0x243   :  { %4107 = vmatprep.subr.bf16.mxu0 %v4621_v20 }
 0x244   :  { %3444 = vmatpush2.bf16.msra.mxu1 %v4618_v0 }
 0x245   :  { %v2756_v46 = vpop.f32.mrf.mxu0  ;;  %v2797_v50 = vpop.f32.mrf.mxu1 }
 0x246   :  { %v2757_v49 = vadd.f32 %v2756_v46, %v2716_v7 }
 0x247   :  { %v2758_v52 = vpop.f32.mrf.mxu0  ;;  %v2799_v55 = vpop.f32.mrf.mxu1 }
 0x248   :  { %v2798_v53 = vadd.f32 %v2797_v50, %v2757_v49  ;;  %v2759_v54 = vadd.f32 %v2758_v52, %v2718_v48  ;;  %v4634_v52 = vld [vmem:[#allocation7 + $0x8] sm:$0xff]  }
 0x249   :  { %v2760_v56 = vpop.f32.mrf.mxu0  ;;  %v2801_v34 = vpop.f32.mrf.mxu1 }
 0x24a   :  { %v2800_v58 = vadd.f32 %v2799_v55, %v2759_v54  ;;  %v2968_v60 = vmax.f32 %v2798_v53, 0.0  ;;  %v4635_v55 = vld [vmem:[#allocation7 + $0x40] sm:$0xff]   ;;  %v3049_v34 = vrot.slane %v3040_v37, %v4827_v14 }
 0x24b   :  { %v2761_v38 = vpop.f32.mrf.mxu0  ;;  %v2802_v62 = vpop.f32.mrf.mxu1  ;;  %v4636_v56 = vld [vmem:[#allocation7] sm:$0xff]  }
 0x24c   :  { %v2969_v61 = vmax.f32 %v2800_v58, 0.0  ;;  %v2972_v1 = vpack.c.bf16 %v2968_v60, %v2968_v60  ;;  %v3045_v58 = vrot.slane %v3040_v37, %v4818_v10  ;;  %v4090_v10 = vld [vmem:[%s4926_s8] ss:$0 sm:$0xff] }
 0x24e   :  { %v2973_v63 = vpack.c.bf16 %v2969_v61, %v2969_v61 }
 0x250   :  { %3404 = vmatprep.mubr.bf16.mxu0 %v2973_v63 }
 0x251   :  { %3405 = vmatmul.mubr.bf16.vlgmr.msra.gmra.mxu0 %v2972_v1 }
 0x252   :  { %4108 = vmatpush3.bf16.msra.mxu0 %v4622_v21 }
 0x253   :  { %4109 = vmatprep.subr.bf16.mxu0 %v4623_v22 }
 0x256   :  { %4110 = vmatpush3.bf16.msra.mxu0 %v4624_v23 }
 0x257   :  { %4111 = vmatprep.subr.bf16.mxu0 %v4625_v24 }
 0x25a   :  { %4112 = vmatpush3.bf16.msra.mxu0 %v4626_v13 }
 0x25b   :  { %4113 = vmatprep.subr.bf16.mxu0 %v4627_v25 }
 0x25e   :  { %4114 = vmatpush3.bf16.msra.mxu0 %v4628_v26 }
 0x25f   :  { %4115 = vmatprep.subr.bf16.mxu0 %v4629_v27 }
 0x262   :  { %4116 = vmatpush3.bf16.msra.mxu0 %v4630_v28 }
 0x263   :  { %4117 = vmatprep.subr.bf16.mxu0 %v4631_v29 }
 0x266   :  { %4118 = vmatpush3.bf16.msra.mxu0 %v4632_v30 }
 0x267   :  { %4119 = vmatprep.subr.bf16.mxu0 %v4633_v51 }
 0x26a   :  { %4120 = vmatpush3.bf16.msra.mxu0 %v4634_v52 }
 0x26b   :  { %4121 = vmatprep.subr.bf16.mxu0 %v4635_v55 }
 0x26e   :  { %4122 = vmatpush3.bf16.msra.mxu0 %v4636_v56 }
 0x285   :  { %v2838_v2 = vpop.f32.mrf.mxu0  ;;  %v2879_v11 = vpop.f32.mrf.mxu1 }
 0x286   :  { %v2839_v32 = vadd.f32 %v2838_v2, %v1351_v35 }
 0x287   :  { %v2840_v3 = vpop.f32.mrf.mxu0  ;;  %v2881_v4 = vpop.f32.mrf.mxu1 }
 0x288   :  { %v2841_v39 = vadd.f32 %v2840_v3, %v1355_v31  ;;  %v2880_v33 = vadd.f32 %v2879_v11, %v2839_v32 }
 0x289   :  { %v2842_v5 = vpop.f32.mrf.mxu0  ;;  %v2883_v6 = vpop.f32.mrf.mxu1 }
 0x28a   :  { %v2882_v41 = vadd.f32 %v2881_v4, %v2841_v39 }
 0x28b   :  { %v2843_v16 = vpop.f32.mrf.mxu0  ;;  %v2884_v17 = vpop.f32.mrf.mxu1 }
 0x2c5   :  { %v2920_v36 = vpop.f32.mrf.mxu0 }
 0x2c6   :  { %v2921_v42 = vadd.f32 %v2920_v36, %v2880_v33  ;;  %v2961_v57 = vpop.f32.mrf.mxu1 }
 0x2c7   :  { %v2922_v19 = vpop.f32.mrf.mxu0 }
 0x2c8   :  { %v2962_v43 = vadd.f32 %v2961_v57, %v2921_v42  ;;  %v2923_v18 = vadd.f32 %v2922_v19, %v2882_v41  ;;  %v2963_v44 = vpop.f32.mrf.mxu1 }
 0x2c9   :  { %v2924_v45 = vpop.f32.mrf.mxu0 }
 0x2ca   :  { %v2964_v7 = vadd.f32 %v2963_v44, %v2923_v18  ;;  %v2965_v46 = vpop.f32.mrf.mxu1  ;;  %v2970_v47 = vmax.f32 %v2962_v43, 0.0 }
 0x2cb   :  { %v2925_v12 = vpop.f32.mrf.mxu0 }
 0x2cc   :  { %v2971_v48 = vmax.f32 %v2964_v7, 0.0  ;;  %v2966_v9 = vpop.f32.mrf.mxu1  ;;  %v2974_v15 = vpack.c.bf16 %v2970_v47, %v2970_v47 }
 0x2ce   :  { %v2975_v49 = vpack.c.bf16 %v2971_v48, %v2971_v48 }
 0x2d0   :  { %3445 = vmatprep.mubr.bf16.mxu1 %v2975_v49 }
 0x2d1   :  { %3446 = vmatmul.mubr.bf16.vlgmr.msra.gmra.mxu1 %v2974_v15 }
 0x311   :  { %v3406_v40 = vpop.f32.mrf.mxu0 }
 0x312   :  { %v3407_v59 = vadd.f32 %v3406_v40, %v3045_v58 }
 0x313   :  { %v3408_v50 = vpop.f32.mrf.mxu0 }
 0x314   :  { %v3409_v38 = vadd.f32 %v3408_v50, %v3049_v34 }
 0x315   :  { %v3410_v53 = vpop.f32.mrf.mxu0 }
 0x317   :  { %v3411_v54 = vpop.f32.mrf.mxu0 }
 0x391   :  { %v3447_v60 = vpop.f32.mrf.mxu1 }
 0x392   :  { %v3448_v61 = vadd.f32 %v3447_v60, %v3407_v59 }
 0x393   :  { %v3449_v62 = vpop.f32.mrf.mxu1 }
 0x394   :  { %v3450_v8 = vadd.f32 %v3449_v62, %v3409_v38  ;;  %v3454_v63 = vmax.f32 %v3448_v61, 0.0 }
 0x395   :  { %v3451_v0 = vpop.f32.mrf.mxu1 }
 0x396   :  { %v3455_v1 = vmax.f32 %v3450_v8, 0.0  ;;  %v3456_v3 = vpack.c.bf16 %v3454_v63, %v3454_v63 }
 0x397   :  { %v3452_v2 = vpop.f32.mrf.mxu1 }
 0x398   :  { %v3457_v11 = vpack.c.bf16 %v3455_v1, %v3455_v1 }
 0x39a   :  { %3625 = vmatprep.mubr.bf16.mxu0 %v3457_v11 }
 0x39b   :  { %3626 = vmatmul.mubr.bf16.vlgmr.msra.gmra.mxu0 %v3456_v3 }
 0x45b   :  { %v4123_v4 = vpop.f32.mrf.mxu0 }
 0x45d   :  { %v4124_v14 = vpop.f32.mrf.mxu0 }
 0x45e   :  { %v4125_v5 = vadd.f32 %v4124_v14, %v4123_v4 }
 0x45f   :  { %v4126_v6 = vpop.f32.mrf.mxu0 }
 0x460   :  { %v3628_v16 = vadd.f32 %v4125_v5, %v4090_v10 }
 0x461   :  { %v4127_v17 = vpop.f32.mrf.mxu0 }
 0x462   :  { %v3633_v20 = vpack.c.bf16 %v3628_v16, %v3628_v16 }
 0x464   :  { %3634 = vst [vmem:[%s4927_s9] sm:$0xf] %v3633_v20 }
 0x465   :  { %3639 = vsyncpa [#allocation3], 1 }
 0x466   :  { %3640 = vsyncpa [#allocation5], 1 }
 0x467   :  { %3641 = vsyncpa [#allocation8], 1 }

</bundles_post_ra>
